<compile_context>
chip_gen: v5e
topology: v5e:2x2
jax: 0.10.0
libtpu: 0.0.40
codegen_flags: <defaults>
</compile_context>

<pallas_src>
import functools

import jax
import jax.numpy as jnp
from jax.experimental import pallas as pl
from jax.experimental.pallas import tpu as pltpu


def _round_up(x, m):
    return (x + m - 1) // m * m


def _pick_row_tile(Ho, Wo):
    """Largest divisor of Ho with ~<=128 output pixels per tile and a
    sublane-aligned flat tile (TH*Wo % 8 == 0)."""
    target = max(1, 128 // max(Wo, 1))
    best = None
    for d in range(1, Ho + 1):
        if Ho % d == 0 and d <= target and (d * Wo) % 8 == 0:
            best = d
    return best if best is not None else Ho


def _basic_conv_kernel(x_ref, w_ref, scale_ref, shift_ref, o_ref,
                       *, TH, Wo, KH, KW, Cin_p, Cout, relu):
    # x_ref:       (Hp, Wp, Cin_p)         padded image, resident across row tiles
    # w_ref:       (KH*KW, Cin_p, Cout_p)  folded per-tap weights (resident)
    # scale/shift: (1, Cout_p)             folded eval-mode BN scale / shift
    # o_ref:       (TH*Wo, Cout)           one row-tile of the flat output slab
    Cout_p = w_ref.shape[-1]
    r0 = pl.program_id(1) * TH            # first output row of this tile

    acc = jnp.zeros((TH * Wo, Cout_p), jnp.float32)
    for kh in range(KH):
        for kw in range(KW):
            t = kh * KW + kw
            # Lane-dense shifted window -- no patch-buffer stores.  The
            # (TH, Wo) -> TH*Wo collapse is a free view when Wo is a multiple
            # of the bf16 sublane pack (16), which holds for this config.
            win = x_ref[pl.ds(r0 + kh, TH), kw:kw + Wo, :]
            acc = acc + jnp.dot(win.reshape(TH * Wo, Cin_p), w_ref[t],
                                preferred_element_type=jnp.float32)

    # Fused BN (eval-mode, folded) + ReLU epilogue in f32.
    y = acc * scale_ref[...] + shift_ref[...]
    if relu:
        y = jnp.maximum(y, 0.0)
    # Only the real Cout channels go back to HBM (no zero-padded writeback).
    o_ref[...] = y[:, :Cout].astype(o_ref.dtype)


def basic_conv(x_nchw, weight, gamma, beta, running_mean, running_var,
               *, stride=1, padding=0, dilation=1, groups=1,
               relu=True, bn=True, eps=1e-5):
    """BasicConv forward. x_nchw: (N, Cin, H, W). weight: (Cout, Cin, KH, KW)."""
    assert stride == 1 and dilation == 1 and groups == 1
    # TODO(synk): stride/dilation/groups != 1 and train-mode BN statistics
    # are not implemented in this kernel (module defaults are covered).

    N, Cin, H, W = x_nchw.shape
    Cout, Cin_w, KH, KW = weight.shape
    assert Cin_w == Cin

    Ho = H + 2 * padding - KH + 1
    Wo = W + 2 * padding - KW + 1

    Cin_p = _round_up(Cin, 16)        # bf16 sublane pack for the weight K dim
    Cout_p = _round_up(Cout, 128)     # lane-dense MXU columns

    # Glue: NCHW -> NHWC, bf16 cast, spatial halo + channel zero-pad.
    x_nhwc = jnp.transpose(x_nchw.astype(jnp.bfloat16), (0, 2, 3, 1))
    x_pad = jnp.pad(x_nhwc, ((0, 0), (padding, padding), (padding, padding),
                             (0, Cin_p - Cin)))
    Hp, Wp = x_pad.shape[1], x_pad.shape[2]

    # weight (Cout, Cin, KH, KW) -> per-tap (KH*KW, Cin_p, Cout_p) bf16.
    w_hwio = jnp.transpose(weight, (2, 3, 1, 0)).astype(jnp.float32)
    w_hwio = jnp.pad(w_hwio, ((0, 0), (0, 0),
                              (0, Cin_p - Cin), (0, Cout_p - Cout)))
    w_taps = w_hwio.reshape(KH * KW, Cin_p, Cout_p).astype(jnp.bfloat16)

    # Fold BN (eval semantics) into per-channel scale/shift; padded cols = 0.
    if bn:
        scale = gamma / jnp.sqrt(running_var + eps)
        shift = beta - running_mean * scale
    else:
        scale = jnp.ones((Cout,), jnp.float32)
        shift = jnp.zeros((Cout,), jnp.float32)
    scale = jnp.pad(scale.astype(jnp.float32), (0, Cout_p - Cout)).reshape(1, Cout_p)
    shift = jnp.pad(shift.astype(jnp.float32), (0, Cout_p - Cout)).reshape(1, Cout_p)

    TH = _pick_row_tile(Ho, Wo)
    RT = Ho // TH

    # Explicit VMEM budget: 2x double-buffered input + output blocks,
    # resident weights + BN vectors; cap safely under v7x's 64 MiB physical.
    in_blk = Hp * Wp * Cin_p * 2
    out_blk = TH * Wo * Cout * 4
    w_bytes = KH * KW * Cin_p * Cout_p * 2
    ss_bytes = 2 * 2 * Cout_p * 4
    vmem_est = 2 * in_blk + 2 * out_blk + w_bytes + ss_bytes
    vmem_limit = int(min(48 << 20, max(16 << 20, 2 * vmem_est + (4 << 20))))

    kernel = functools.partial(_basic_conv_kernel, TH=TH, Wo=Wo, KH=KH, KW=KW,
                               Cin_p=Cin_p, Cout=Cout, relu=relu)

    out_slab = pl.pallas_call(
        kernel,
        out_shape=jax.ShapeDtypeStruct((N, Ho * Wo, Cout), jnp.float32),
        grid_spec=pltpu.PrefetchScalarGridSpec(
            num_scalar_prefetch=0,
            grid=(N, RT),
            in_specs=[
                # Whole padded image, constant along the row-tile axis
                # (stays resident; re-fetched only when n changes).
                pl.BlockSpec((None, Hp, Wp, Cin_p), lambda n, r: (n, 0, 0, 0)),
                pl.BlockSpec((KH * KW, Cin_p, Cout_p), lambda n, r: (0, 0, 0)),
                pl.BlockSpec((1, Cout_p), lambda n, r: (0, 0)),
                pl.BlockSpec((1, Cout_p), lambda n, r: (0, 0)),
            ],
            out_specs=pl.BlockSpec((None, TH * Wo, Cout),
                                   lambda n, r: (n, r, 0)),
        ),
        compiler_params=pltpu.CompilerParams(
            dimension_semantics=("parallel", "parallel"),
            vmem_limit_bytes=vmem_limit),
    )(x_pad, w_taps, scale, shift)

    # Flat slab -> NHWC -> NCHW (PyTorch convention).
    out = out_slab.reshape(N, Ho, Wo, Cout)
    return jnp.transpose(out, (0, 3, 1, 2))


def _reference(x_nchw, weight, gamma, beta, mean, var, *, padding, eps=1e-5):
    y = jax.lax.conv_general_dilated(
        x_nchw.astype(jnp.float32), weight.astype(jnp.float32),
        window_strides=(1, 1),
        padding=[(padding, padding), (padding, padding)],
        dimension_numbers=("NCHW", "OIHW", "NCHW"))
    scale = (gamma / jnp.sqrt(var + eps)).reshape(1, -1, 1, 1)
    shift = (beta - mean * gamma / jnp.sqrt(var + eps)).reshape(1, -1, 1, 1)
    return jnp.maximum(y * scale + shift, 0.0)


if __name__ == "__main__":
    # Module config: BasicConv(in_planes=4, out_planes=8, kernel_size=3, padding=1)
    N, Cin, H, W = 2, 4, 16, 16
    Cout, KH, KW = 8, 3, 3
    padding = 1

    key = jax.random.PRNGKey(0)
    kx, kw_, kg, kb, km, kv = jax.random.split(key, 6)

    x = jax.random.normal(kx, (N, Cin, H, W), jnp.float32)
    weight = jax.random.normal(kw_, (Cout, Cin, KH, KW), jnp.float32) * 0.1
    gamma = jax.random.normal(kg, (Cout,), jnp.float32) * 0.1 + 1.0
    beta = jax.random.normal(kb, (Cout,), jnp.float32) * 0.1
    running_mean = jax.random.normal(km, (Cout,), jnp.float32) * 0.1
    running_var = jax.nn.softplus(jax.random.normal(kv, (Cout,), jnp.float32)) + 0.5

    out = basic_conv(x, weight, gamma, beta, running_mean, running_var,
                     stride=1, padding=padding, relu=True, bn=True)
    out = jax.block_until_ready(out)

    # Reference from bf16-rounded inputs (kernel feeds the MXU bf16 with f32
    # accumulation) so the comparison stays tight.
    x_bf = x.astype(jnp.bfloat16).astype(jnp.float32)
    w_bf = weight.astype(jnp.bfloat16).astype(jnp.float32)
    ref = _reference(x_bf, w_bf, gamma, beta, running_mean, running_var,
                     padding=padding)

    assert out.shape == (N, Cout, H, W)
    assert jnp.allclose(out, ref, atol=1e-2, rtol=1e-2)
    print("KERNEL_OK")
</pallas_src>

<mosaic_0001>
module attributes {stable_mosaic.version = 11 : i64} {
  func.func @_basic_conv_kernel(%arg0: i32, %arg1: i32, %arg2: memref<1x18x18x16xbf16, #tpu.memory_space<vmem>>, %arg3: memref<9x16x128xbf16, #tpu.memory_space<vmem>>, %arg4: memref<1x128xf32, #tpu.memory_space<vmem>>, %arg5: memref<1x128xf32, #tpu.memory_space<vmem>>, %arg6: memref<1x128x8xf32, #tpu.memory_space<vmem>>) attributes {dimension_semantics = [#tpu.dimension_semantics<parallel>, #tpu.dimension_semantics<parallel>], iteration_bounds = array<i64: 2, 2>, scalar_prefetch = 0 : i64, scratch_operands = 0 : i64, tpu.core_type = #tpu.core_type<tc>, window_params = [{transform_indices = @transform_0, window_bounds = array<i64: 1, 18, 18, 16>}, {pipeline_mode = #tpu.pipeline_mode<synchronous>, transform_indices = @transform_1, window_bounds = array<i64: 9, 16, 128>}, {pipeline_mode = #tpu.pipeline_mode<synchronous>, transform_indices = @transform_2, window_bounds = array<i64: 1, 128>}, {pipeline_mode = #tpu.pipeline_mode<synchronous>, transform_indices = @transform_3, window_bounds = array<i64: 1, 128>}, {transform_indices = @transform_4, window_bounds = array<i64: 1, 128, 8>}]} {
    %c8_i32 = arith.constant 8 : i32
    %0 = arith.muli %arg1, %c8_i32 : i32
    %cst = arith.constant 0.000000e+00 : f32
    %1 = vector.broadcast %cst : f32 to vector<128x128xf32>
    %c0_i32 = arith.constant 0 : i32
    %2 = arith.addi %0, %c0_i32 : i32
    %c0 = arith.constant 0 : index
    %3 = arith.index_cast %2 : i32 to index
    %c0_0 = arith.constant 0 : index
    %c0_1 = arith.constant 0 : index
    %4 = vector.load %arg2[%c0, %3, %c0_0, %c0_1] : memref<1x18x18x16xbf16, #tpu.memory_space<vmem>>, vector<1x8x16x16xbf16>
    %5 = vector.shape_cast %4 : vector<1x8x16x16xbf16> to vector<8x16x16xbf16>
    %6 = vector.shape_cast %5 : vector<8x16x16xbf16> to vector<128x16xbf16>
    %c0_2 = arith.constant 0 : index
    %c0_3 = arith.constant 0 : index
    %c0_4 = arith.constant 0 : index
    %7 = vector.load %arg3[%c0_2, %c0_3, %c0_4] : memref<9x16x128xbf16, #tpu.memory_space<vmem>>, vector<1x16x128xbf16>
    %8 = vector.shape_cast %7 : vector<1x16x128xbf16> to vector<16x128xbf16>
    %cst_5 = arith.constant dense<0.000000e+00> : vector<128x128xf32>
    %9 = tpu.matmul %6, %8, %cst_5 {dimension_numbers = #tpu.dot_dimension_numbers<[1], [0], [0], [1], [0, 0, 1, 1], [], []>} : vector<128x16xbf16>, vector<16x128xbf16>, vector<128x128xf32> -> vector<128x128xf32>
    %10 = arith.addf %1, %9 : vector<128x128xf32>
    %c0_i32_6 = arith.constant 0 : i32
    %11 = arith.addi %0, %c0_i32_6 : i32
    %c0_7 = arith.constant 0 : index
    %12 = arith.index_cast %11 : i32 to index
    %c1 = arith.constant 1 : index
    %c0_8 = arith.constant 0 : index
    %13 = vector.load %arg2[%c0_7, %12, %c1, %c0_8] : memref<1x18x18x16xbf16, #tpu.memory_space<vmem>>, vector<1x8x16x16xbf16>
    %14 = vector.shape_cast %13 : vector<1x8x16x16xbf16> to vector<8x16x16xbf16>
    %15 = vector.shape_cast %14 : vector<8x16x16xbf16> to vector<128x16xbf16>
    %c1_9 = arith.constant 1 : index
    %c0_10 = arith.constant 0 : index
    %c0_11 = arith.constant 0 : index
    %16 = vector.load %arg3[%c1_9, %c0_10, %c0_11] : memref<9x16x128xbf16, #tpu.memory_space<vmem>>, vector<1x16x128xbf16>
    %17 = vector.shape_cast %16 : vector<1x16x128xbf16> to vector<16x128xbf16>
    %cst_12 = arith.constant dense<0.000000e+00> : vector<128x128xf32>
    %18 = tpu.matmul %15, %17, %cst_12 {dimension_numbers = #tpu.dot_dimension_numbers<[1], [0], [0], [1], [0, 0, 1, 1], [], []>} : vector<128x16xbf16>, vector<16x128xbf16>, vector<128x128xf32> -> vector<128x128xf32>
    %19 = arith.addf %10, %18 : vector<128x128xf32>
    %c0_i32_13 = arith.constant 0 : i32
    %20 = arith.addi %0, %c0_i32_13 : i32
    %c0_14 = arith.constant 0 : index
    %21 = arith.index_cast %20 : i32 to index
    %c2 = arith.constant 2 : index
    %c0_15 = arith.constant 0 : index
    %22 = vector.load %arg2[%c0_14, %21, %c2, %c0_15] : memref<1x18x18x16xbf16, #tpu.memory_space<vmem>>, vector<1x8x16x16xbf16>
    %23 = vector.shape_cast %22 : vector<1x8x16x16xbf16> to vector<8x16x16xbf16>
    %24 = vector.shape_cast %23 : vector<8x16x16xbf16> to vector<128x16xbf16>
    %c2_16 = arith.constant 2 : index
    %c0_17 = arith.constant 0 : index
    %c0_18 = arith.constant 0 : index
    %25 = vector.load %arg3[%c2_16, %c0_17, %c0_18] : memref<9x16x128xbf16, #tpu.memory_space<vmem>>, vector<1x16x128xbf16>
    %26 = vector.shape_cast %25 : vector<1x16x128xbf16> to vector<16x128xbf16>
    %cst_19 = arith.constant dense<0.000000e+00> : vector<128x128xf32>
    %27 = tpu.matmul %24, %26, %cst_19 {dimension_numbers = #tpu.dot_dimension_numbers<[1], [0], [0], [1], [0, 0, 1, 1], [], []>} : vector<128x16xbf16>, vector<16x128xbf16>, vector<128x128xf32> -> vector<128x128xf32>
    %28 = arith.addf %19, %27 : vector<128x128xf32>
    %c1_i32 = arith.constant 1 : i32
    %29 = arith.addi %0, %c1_i32 : i32
    %c0_20 = arith.constant 0 : index
    %30 = arith.index_cast %29 : i32 to index
    %c0_21 = arith.constant 0 : index
    %c0_22 = arith.constant 0 : index
    %31 = vector.load %arg2[%c0_20, %30, %c0_21, %c0_22] : memref<1x18x18x16xbf16, #tpu.memory_space<vmem>>, vector<1x8x16x16xbf16>
    %32 = vector.shape_cast %31 : vector<1x8x16x16xbf16> to vector<8x16x16xbf16>
    %33 = vector.shape_cast %32 : vector<8x16x16xbf16> to vector<128x16xbf16>
    %c3 = arith.constant 3 : index
    %c0_23 = arith.constant 0 : index
    %c0_24 = arith.constant 0 : index
    %34 = vector.load %arg3[%c3, %c0_23, %c0_24] : memref<9x16x128xbf16, #tpu.memory_space<vmem>>, vector<1x16x128xbf16>
    %35 = vector.shape_cast %34 : vector<1x16x128xbf16> to vector<16x128xbf16>
    %cst_25 = arith.constant dense<0.000000e+00> : vector<128x128xf32>
    %36 = tpu.matmul %33, %35, %cst_25 {dimension_numbers = #tpu.dot_dimension_numbers<[1], [0], [0], [1], [0, 0, 1, 1], [], []>} : vector<128x16xbf16>, vector<16x128xbf16>, vector<128x128xf32> -> vector<128x128xf32>
    %37 = arith.addf %28, %36 : vector<128x128xf32>
    %c1_i32_26 = arith.constant 1 : i32
    %38 = arith.addi %0, %c1_i32_26 : i32
    %c0_27 = arith.constant 0 : index
    %39 = arith.index_cast %38 : i32 to index
    %c1_28 = arith.constant 1 : index
    %c0_29 = arith.constant 0 : index
    %40 = vector.load %arg2[%c0_27, %39, %c1_28, %c0_29] : memref<1x18x18x16xbf16, #tpu.memory_space<vmem>>, vector<1x8x16x16xbf16>
    %41 = vector.shape_cast %40 : vector<1x8x16x16xbf16> to vector<8x16x16xbf16>
    %42 = vector.shape_cast %41 : vector<8x16x16xbf16> to vector<128x16xbf16>
    %c4 = arith.constant 4 : index
    %c0_30 = arith.constant 0 : index
    %c0_31 = arith.constant 0 : index
    %43 = vector.load %arg3[%c4, %c0_30, %c0_31] : memref<9x16x128xbf16, #tpu.memory_space<vmem>>, vector<1x16x128xbf16>
    %44 = vector.shape_cast %43 : vector<1x16x128xbf16> to vector<16x128xbf16>
    %cst_32 = arith.constant dense<0.000000e+00> : vector<128x128xf32>
    %45 = tpu.matmul %42, %44, %cst_32 {dimension_numbers = #tpu.dot_dimension_numbers<[1], [0], [0], [1], [0, 0, 1, 1], [], []>} : vector<128x16xbf16>, vector<16x128xbf16>, vector<128x128xf32> -> vector<128x128xf32>
    %46 = arith.addf %37, %45 : vector<128x128xf32>
    %c1_i32_33 = arith.constant 1 : i32
    %47 = arith.addi %0, %c1_i32_33 : i32
    %c0_34 = arith.constant 0 : index
    %48 = arith.index_cast %47 : i32 to index
    %c2_35 = arith.constant 2 : index
    %c0_36 = arith.constant 0 : index
    %49 = vector.load %arg2[%c0_34, %48, %c2_35, %c0_36] : memref<1x18x18x16xbf16, #tpu.memory_space<vmem>>, vector<1x8x16x16xbf16>
    %50 = vector.shape_cast %49 : vector<1x8x16x16xbf16> to vector<8x16x16xbf16>
    %51 = vector.shape_cast %50 : vector<8x16x16xbf16> to vector<128x16xbf16>
    %c5 = arith.constant 5 : index
    %c0_37 = arith.constant 0 : index
    %c0_38 = arith.constant 0 : index
    %52 = vector.load %arg3[%c5, %c0_37, %c0_38] : memref<9x16x128xbf16, #tpu.memory_space<vmem>>, vector<1x16x128xbf16>
    %53 = vector.shape_cast %52 : vector<1x16x128xbf16> to vector<16x128xbf16>
    %cst_39 = arith.constant dense<0.000000e+00> : vector<128x128xf32>
    %54 = tpu.matmul %51, %53, %cst_39 {dimension_numbers = #tpu.dot_dimension_numbers<[1], [0], [0], [1], [0, 0, 1, 1], [], []>} : vector<128x16xbf16>, vector<16x128xbf16>, vector<128x128xf32> -> vector<128x128xf32>
    %55 = arith.addf %46, %54 : vector<128x128xf32>
    %c2_i32 = arith.constant 2 : i32
    %56 = arith.addi %0, %c2_i32 : i32
    %c0_40 = arith.constant 0 : index
    %57 = arith.index_cast %56 : i32 to index
    %c0_41 = arith.constant 0 : index
    %c0_42 = arith.constant 0 : index
    %58 = vector.load %arg2[%c0_40, %57, %c0_41, %c0_42] : memref<1x18x18x16xbf16, #tpu.memory_space<vmem>>, vector<1x8x16x16xbf16>
    %59 = vector.shape_cast %58 : vector<1x8x16x16xbf16> to vector<8x16x16xbf16>
    %60 = vector.shape_cast %59 : vector<8x16x16xbf16> to vector<128x16xbf16>
    %c6 = arith.constant 6 : index
    %c0_43 = arith.constant 0 : index
    %c0_44 = arith.constant 0 : index
    %61 = vector.load %arg3[%c6, %c0_43, %c0_44] : memref<9x16x128xbf16, #tpu.memory_space<vmem>>, vector<1x16x128xbf16>
    %62 = vector.shape_cast %61 : vector<1x16x128xbf16> to vector<16x128xbf16>
    %cst_45 = arith.constant dense<0.000000e+00> : vector<128x128xf32>
    %63 = tpu.matmul %60, %62, %cst_45 {dimension_numbers = #tpu.dot_dimension_numbers<[1], [0], [0], [1], [0, 0, 1, 1], [], []>} : vector<128x16xbf16>, vector<16x128xbf16>, vector<128x128xf32> -> vector<128x128xf32>
    %64 = arith.addf %55, %63 : vector<128x128xf32>
    %c2_i32_46 = arith.constant 2 : i32
    %65 = arith.addi %0, %c2_i32_46 : i32
    %c0_47 = arith.constant 0 : index
    %66 = arith.index_cast %65 : i32 to index
    %c1_48 = arith.constant 1 : index
    %c0_49 = arith.constant 0 : index
    %67 = vector.load %arg2[%c0_47, %66, %c1_48, %c0_49] : memref<1x18x18x16xbf16, #tpu.memory_space<vmem>>, vector<1x8x16x16xbf16>
    %68 = vector.shape_cast %67 : vector<1x8x16x16xbf16> to vector<8x16x16xbf16>
    %69 = vector.shape_cast %68 : vector<8x16x16xbf16> to vector<128x16xbf16>
    %c7 = arith.constant 7 : index
    %c0_50 = arith.constant 0 : index
    %c0_51 = arith.constant 0 : index
    %70 = vector.load %arg3[%c7, %c0_50, %c0_51] : memref<9x16x128xbf16, #tpu.memory_space<vmem>>, vector<1x16x128xbf16>
    %71 = vector.shape_cast %70 : vector<1x16x128xbf16> to vector<16x128xbf16>
    %cst_52 = arith.constant dense<0.000000e+00> : vector<128x128xf32>
    %72 = tpu.matmul %69, %71, %cst_52 {dimension_numbers = #tpu.dot_dimension_numbers<[1], [0], [0], [1], [0, 0, 1, 1], [], []>} : vector<128x16xbf16>, vector<16x128xbf16>, vector<128x128xf32> -> vector<128x128xf32>
    %73 = arith.addf %64, %72 : vector<128x128xf32>
    %c2_i32_53 = arith.constant 2 : i32
    %74 = arith.addi %0, %c2_i32_53 : i32
    %c0_54 = arith.constant 0 : index
    %75 = arith.index_cast %74 : i32 to index
    %c2_55 = arith.constant 2 : index
    %c0_56 = arith.constant 0 : index
    %76 = vector.load %arg2[%c0_54, %75, %c2_55, %c0_56] : memref<1x18x18x16xbf16, #tpu.memory_space<vmem>>, vector<1x8x16x16xbf16>
    %77 = vector.shape_cast %76 : vector<1x8x16x16xbf16> to vector<8x16x16xbf16>
    %78 = vector.shape_cast %77 : vector<8x16x16xbf16> to vector<128x16xbf16>
    %c8 = arith.constant 8 : index
    %c0_57 = arith.constant 0 : index
    %c0_58 = arith.constant 0 : index
    %79 = vector.load %arg3[%c8, %c0_57, %c0_58] : memref<9x16x128xbf16, #tpu.memory_space<vmem>>, vector<1x16x128xbf16>
    %80 = vector.shape_cast %79 : vector<1x16x128xbf16> to vector<16x128xbf16>
    %cst_59 = arith.constant dense<0.000000e+00> : vector<128x128xf32>
    %81 = tpu.matmul %78, %80, %cst_59 {dimension_numbers = #tpu.dot_dimension_numbers<[1], [0], [0], [1], [0, 0, 1, 1], [], []>} : vector<128x16xbf16>, vector<16x128xbf16>, vector<128x128xf32> -> vector<128x128xf32>
    %82 = arith.addf %73, %81 : vector<128x128xf32>
    %c0_60 = arith.constant 0 : index
    %c0_61 = arith.constant 0 : index
    %83 = vector.load %arg4[%c0_60, %c0_61] : memref<1x128xf32, #tpu.memory_space<vmem>>, vector<1x128xf32>
    %84 = vector.broadcast %83 : vector<1x128xf32> to vector<128x128xf32>
    %85 = arith.mulf %82, %84 : vector<128x128xf32>
    %c0_62 = arith.constant 0 : index
    %c0_63 = arith.constant 0 : index
    %86 = vector.load %arg5[%c0_62, %c0_63] : memref<1x128xf32, #tpu.memory_space<vmem>>, vector<1x128xf32>
    %87 = vector.broadcast %86 : vector<1x128xf32> to vector<128x128xf32>
    %88 = arith.addf %85, %87 : vector<128x128xf32>
    %cst_64 = arith.constant 0.000000e+00 : f32
    %89 = vector.broadcast %cst_64 : f32 to vector<128x128xf32>
    %90 = arith.maximumf %88, %89 : vector<128x128xf32>
    %91 = vector.extract_strided_slice %90 {offsets = [0, 0], sizes = [128, 8], strides = [1, 1]} : vector<128x128xf32> to vector<128x8xf32>
    %c0_65 = arith.constant 0 : index
    %c0_66 = arith.constant 0 : index
    %c0_67 = arith.constant 0 : index
    %92 = vector.load %arg6[%c0_65, %c0_66, %c0_67] : memref<1x128x8xf32, #tpu.memory_space<vmem>>, vector<1x128x8xf32>
    %93 = vector.shape_cast %92 : vector<1x128x8xf32> to vector<128x8xf32>
    %94 = vector.shape_cast %91 : vector<128x8xf32> to vector<1x128x8xf32>
    tpu.vector_store %arg6[%c0_65, %c0_66, %c0_67], %94 {strides = array<i32>} : memref<1x128x8xf32, #tpu.memory_space<vmem>>, vector<1x128x8xf32>,
    return
  }
  func.func @transform_0(%arg0: i32, %arg1: i32) -> (i32, i32, i32, i32) {
    %c0_i32 = arith.constant 0 : i32
    %c0_i32_0 = arith.constant 0 : i32
    %c0_i32_1 = arith.constant 0 : i32
    %c0_i32_2 = arith.constant 0 : i32
    return %arg0, %c0_i32, %c0_i32_0, %c0_i32_1 : i32, i32, i32, i32
  }
  func.func @transform_1(%arg0: i32, %arg1: i32) -> (i32, i32, i32) {
    %c0_i32 = arith.constant 0 : i32
    %c0_i32_0 = arith.constant 0 : i32
    %c0_i32_1 = arith.constant 0 : i32
    %c0_i32_2 = arith.constant 0 : i32
    return %c0_i32, %c0_i32_0, %c0_i32_1 : i32, i32, i32
  }
  func.func @transform_2(%arg0: i32, %arg1: i32) -> (i32, i32) {
    %c0_i32 = arith.constant 0 : i32
    %c0_i32_0 = arith.constant 0 : i32
    %c0_i32_1 = arith.constant 0 : i32
    return %c0_i32, %c0_i32_0 : i32, i32
  }
  func.func @transform_3(%arg0: i32, %arg1: i32) -> (i32, i32) {
    %c0_i32 = arith.constant 0 : i32
    %c0_i32_0 = arith.constant 0 : i32
    %c0_i32_1 = arith.constant 0 : i32
    return %c0_i32, %c0_i32_0 : i32, i32
  }
  func.func @transform_4(%arg0: i32, %arg1: i32) -> (i32, i32, i32) {
    %c0_i32 = arith.constant 0 : i32
    %c0_i32_0 = arith.constant 0 : i32
    return %arg0, %arg1, %c0_i32 : i32, i32, i32
  }
}

</mosaic_0001>

<bundles_post_ra>
// kernel: tpu_custom_call.1
= control target key start
LH: loop header
LB: loop body
LE: loop exit
PB: predicated region body
PF: predicated region fallthrough
CT: control target
= control target key end

     0   :  { %s2960_s15 = smov 0   ;;  %s2962_s16 = smov 0   ;;  %s3821_s0 = inlined_call_operand.vmem [shape: bf16[2,18,18,16], index: 0, kind: input, shape index: {}]   ;;  %s3822_s1 = inlined_call_operand.vmem [shape: bf16[9,16,128], index: 1, kind: input, shape index: {}]   ;;  %s3823_s2 = inlined_call_operand.vmem [shape: f32[1,128], index: 2, kind: input, shape index: {}]   ;;  %s3824_s3 = inlined_call_operand.vmem [shape: f32[1,128], index: 3, kind: input, shape index: {}]   ;;  %s3825_s4 = inlined_call_operand.vmem [shape: f32[2,256,8], index: 4, kind: output, shape index: {}]  }
   0x1   :  { %s2964_s17 = smov 0   ;;  %s2966_s18 = smov 0  }
   0x2   :  { %s2968_s19 = smov 0  }
   0x3 LB: > { %s23_s20 = sadd.s32 1, %s2925_s17  ;;  %s26_s21 = sadd.s32 1, %s2929_s18  ;;  %s2933_s19 = sphi %s2968_s19, %s14_s19   ;;  %s2929_s18 = sphi %s2966_s18, %s3833_s18   ;;  %s2925_s17 = sphi %s2964_s17, %s3832_s17   ;;  %s2921_s16 = sphi %s2962_s16, %s3831_s16   ;;  %s2917_s15 = sphi %s2960_s15, %s3830_s15  }
   0x4   : > { %p24_p0 = scmp.ge.s32.totalorder %s23_s20, 2  ;;  %p2461_p1 = scmp.ge.s32.totalorder %s2933_s19, 1 }
   0x5   : > { %p176_p2 = scmp.lt.s32.totalorder %s2933_s19, 5 }
   0x6   : > { %s3835_s20 = smov (%p24_p0, %s23_s20), 0  ;;  %s3837_s21 = smov (!%p24_p0, %s26_s21), %s2929_s18 }
   0x7   : > { %p177_p3 = pnand %p2461_p1, %p176_p2  ;;  %p28_p4 = scmp.ge.s32.totalorder %s3837_s21, 2 }
   0x8   : > { %p206_p5 = scmp.lt.s32.totalorder (!%p177_p3), %s2921_s16, 1  ;;  %s2815_s26 = smul.u32 (!%p177_p3), 96, %s2917_s15 }
   0x9   : > { %s3839_s21 = smov (%p28_p4, %s3837_s21), 0  ;;  %180 = sbr.rel (%p177_p3) target bundleno = 468 (0x1d4), region = 36 }
   0xe   : > { %v2825_v0 = vld [vmem:[%s3822_s1 + $0x8] sm:$0xff]  ;;  %v2826_v1 = vld [vmem:[%s3822_s1 + $0x10] sm:$0xff]  ;;  %s3841_s16 = smov (!%p206_p5, %s2921_s16), 1  ;;  %v2835_v2 = vld [vmem:[%s3822_s1 + $0x18] sm:$0xff]  ;;  %vm252_vm0 = vsmask.f32 3328 }
   0xf   : > { %2849 = vmatpush.bf16.msra.mxu1 %v2825_v0  ;;  %2850 = vmatpush.bf16.msra.mxu2 %v2825_v0  ;;  %s2852_s27 = smul.u32 216, %s3841_s16  ;;  %v2824_v3 = vld [vmem:[%s3822_s1] sm:$0xff]  ;;  %vm253_vm1 = vsmask.f32 7440  ;;  %vm480_vm2 = vcmask 130048   ;;  %vm697_vm4 = vcmask 1042432  }
  0x10   : > { %2851 = vmatpush.bf16.msra.mxu3 %v2825_v0  ;;  %512 = vmatpush.bf16.msra.mxu0 %v2825_v0  ;;  %v2836_v4 = vld [vmem:[%s3822_s1 + $0x20] sm:$0xff]  ;;  %vm3042_vm3 = vmor %vm252_vm0, %vm253_vm1  ;;  %vm698_vm5 = vcmask 1046532   ;;  %s2464_s28 = sshll.u32 %s3841_s16, 5  ;;  %vm2346_vm7 = vcmask 64512  }
  0x11   : > { %s210_s10 = scalar_lea.vmem %s3821_s0, %s2852_s27  ;;  %vm3156_vm6 = vmor %vm697_vm4, %vm698_vm5  ;;  %s2463_s27 = sshll.u32 %s2917_s15, 4 }
  0x12   : > { %s3014_s11 = scalar_lea.vmem %s210_s10, %s2815_s26  ;;  %p214_p6 = scmp.lt.s32.totalorder %s2463_s27, 31 }
  0x13   : > { %820 = vmatpush.bf16.msrb.mxu2 %v2826_v1  ;;  %631 = vmatpush.bf16.msrb.mxu1 %v2824_v3  ;;  %v230_v5 = vld [vmem:[%s3014_s11 + $0x18] sm:$0xf]  ;;  %v3018_v6 = vld [vmem:[%s3014_s11 + $0x1c] sm:$0xf]  ;;  %v3021_v7 = vld [vmem:[%s3014_s11 + $0x20] sm:$0x1] }
  0x14   : > { %978 = vmatpush.bf16.msrb.mxu3 %v2835_v2  ;;  %1316 = vmatpush.bf16.msrb.mxu0 %v2836_v4  ;;  %v304_v8 = vshrl.u32 %v230_v5, 16  ;;  %v307_v9 = vshll.u32 %v230_v5, 16  ;;  %v313_v10 = vshll.u32 %v3018_v6, 16  ;;  %v317_v11 = vshrl.u32 %v3018_v6, 16  ;;  %v234_v12 = vld [vmem:[%s3014_s11 + $0x30] sm:$0xf] }
  0x15   : > { %v323_v13 = vshll.u32 %v3021_v7, 16  ;;  %v3028_v14 = vld [vmem:[%s3014_s11 + $0x34] sm:$0xf]  ;;  %v3031_v15 = vld [vmem:[%s3014_s11 + $0x38] sm:$0x1]  ;;  %v352_v16 = vshrl.u32 %v234_v12, 16 }
  0x16   : > { %v306_v17 = vrot.slane %v304_v8, 4  ;;  %v309_v18 = vrot.slane %v307_v9, 5  ;;  %v315_v19 = vrot.slane %v313_v10, 5  ;;  %v319_v20 = vrot.slane %v317_v11, 4  ;;  %v238_v21 = vld [vmem:[%s3014_s11 + $0x48] sm:$0xf] }
  0x17   : > { %v325_v22 = vrot.slane %v323_v13, 5  ;;  %v354_v23 = vrot.slane %v352_v16, 4  ;;  %v355_v24 = vshll.u32 %v234_v12, 16  ;;  %v361_v25 = vshll.u32 %v3028_v14, 16  ;;  %v3038_v30 = vld [vmem:[%s3014_s11 + $0x4c] sm:$0xf] }
  0x18   : > { %v310_v26 = vor.u32 %v309_v18, %v306_v17  ;;  %v320_v27 = vor.u32 %v319_v20, %v315_v19  ;;  %v365_v28 = vshrl.u32 %v3028_v14, 16  ;;  %v371_v29 = vshll.u32 %v3031_v15, 16  ;;  %v3047_v41 = vld [vmem:[%s3014_s11 + $0x50] sm:$0x1]  ;;  %v226_v49 = vld [vmem:[%s3014_s11] sm:$0xf] }
  0x19   : > { %v357_v32 = vrot.slane %v355_v24, 5  ;;  %v363_v33 = vrot.slane %v361_v25, 5  ;;  %v400_v34 = vshrl.u32 %v238_v21, 16  ;;  %v403_v35 = vshll.u32 %v238_v21, 16  ;;  %v3060_v61 = vld [vmem:[%s3014_s11 + $0x4] sm:$0xf] }
  0x1a   : > { %v311_v36 = vrot.slane %v310_v26, 4  ;;  %v321_v37 = vrot.slane %v320_v27, 4  ;;  %v367_v38 = vrot.slane %v365_v28, 4  ;;  %v373_v39 = vrot.slane %v371_v29, 5  ;;  %v3065_v3 = vld [vmem:[%s3014_s11 + $0x8] sm:$0x1] }
  0x1b   : > { %v358_v40 = vor.u32 %v357_v32, %v354_v23  ;;  %v402_v42 = vrot.slane %v400_v34, 4  ;;  %v405_v43 = vrot.slane %v403_v35, 5  ;;  %v409_v44 = vshll.u32 %v3038_v30, 16  ;;  %v232_v10 = vld [vmem:[%s3014_s11 + $0x24] sm:$0xf]  ;;  %s3843_s27 = smov (!%p214_p6, %s2463_s27), 31 }
  0x1c   : > { %v316_v45 = vsel %vm3042_vm3, %v311_v36, %v315_v19  ;;  %v326_v46 = vsel %vm3042_vm3, %v321_v37, %v325_v22  ;;  %v368_v47 = vor.u32 %v367_v38, %v363_v33  ;;  %v413_v48 = vshrl.u32 %v3038_v30, 16  ;;  %v3076_v21 = vld [vmem:[%s3014_s11 + $0x28] sm:$0xf]  ;;  %v3081_v25 = vld [vmem:[%s3014_s11 + $0x2c] sm:$0x1]  ;;  %s217_s15 = sadd.s32 %s2464_s28, %s3843_s27 }
  0x1d   : > { %v454_v50 = vunpack.c.l.b16 %v316_v45  ;;  %v455_v51 = vunpack.c.l.b16 %v326_v46  ;;  %v359_v52 = vrot.slane %v358_v40, 4  ;;  %v406_v53 = vor.u32 %v405_v43, %v402_v42  ;;  %v3089_v46 = vld [vmem:[%s3014_s11 + $0x40] sm:$0xf]  ;;  %s2465_s7 = sshll.u32 %s217_s15, 3 }
  0x1e   : > { %v369_v54 = vrot.slane %v368_v47, 4  ;;  %v411_v55 = vrot.slane %v409_v44, 5  ;;  %v415_v56 = vrot.slane %v413_v48, 4  ;;  %v419_v57 = vshll.u32 %v3047_v41, 16  ;;  %s3728_s9 = scalar_lea.vmem %s3825_s4, %s2465_s7 }
  0x1f   : > { %v468_v58 = vpack.c.b16 %v455_v51, %v454_v50  ;;  %v364_v59 = vsel %vm3042_vm3, %v359_v52, %v363_v33  ;;  %v407_v60 = vrot.slane %v406_v53, 4  ;;  %v256_v62 = vshrl.u32 %v226_v49, 16  ;;  %v236_v33 = vld [vmem:[%s3014_s11 + $0x3c] sm:$0xf]  ;;  %v3095_v51 = vld [vmem:[%s3014_s11 + $0x44] sm:$0x1] }
  0x20   : > { %v374_v63 = vsel %vm3042_vm3, %v369_v54, %v373_v39  ;;  %v458_v0 = vunpack.c.l.b16 %v364_v59  ;;  %v416_v1 = vor.u32 %v415_v56, %v411_v55  ;;  %v421_v2 = vrot.slane %v419_v57, 5  ;;  %v240_v53 = vld [vmem:[%s3014_s11 + $0x54] sm:$0xf] }
  0x21   : > { %2477 = vmatmul.msk.bf16.vlgmr.msra.gmra.mxu1 %vm480_vm2, %v468_v58  ;;  %v459_v4 = vunpack.c.l.b16 %v374_v63  ;;  %v412_v5 = vsel %vm3042_vm3, %v407_v60, %v411_v55  ;;  %v258_v8 = vrot.slane %v256_v62, 4  ;;  %v259_v9 = vshll.u32 %v226_v49, 16 }
  0x22   : > { %v417_v11 = vrot.slane %v416_v1, 4  ;;  %v462_v12 = vunpack.c.l.b16 %v412_v5  ;;  %v265_v13 = vshll.u32 %v3060_v61, 16  ;;  %v269_v16 = vshrl.u32 %v3060_v61, 16 }
  0x23   : > { %v470_v17 = vpack.c.b16 %v459_v4, %v458_v0  ;;  %v261_v18 = vrot.slane %v259_v9, 5  ;;  %v275_v19 = vshll.u32 %v3065_v3, 16  ;;  %v705_v20 = vrot.slane %v3065_v3, 5  ;;  %v2616_v3 = vld [vmem:[%s3014_s11 + $0x18] sm:$0xf] }
  0x24   : > { %v422_v22 = vsel %vm3042_vm3, %v417_v11, %v421_v2  ;;  %v267_v23 = vrot.slane %v265_v13, 5  ;;  %v271_v24 = vrot.slane %v269_v16, 4  ;;  %v328_v26 = vshrl.u32 %v232_v10, 16  ;;  %v3109_v11 = vld [vmem:[%s3014_s11 + $0x5c] sm:$0x1] }
  0x25   : > { %2479 = vmatmul.msk.bf16.vlgmr.msra.gmra.mxu2 %vm480_vm2, %v470_v17  ;;  %v463_v27 = vunpack.c.l.b16 %v422_v22  ;;  %v262_v28 = vor.u32 %v261_v18, %v258_v8  ;;  %v277_v29 = vrot.slane %v275_v19, 5  ;;  %v331_v32 = vshll.u32 %v232_v10, 16  ;;  %v3106_v10 = vld [vmem:[%s3014_s11 + $0x58] sm:$0xf]  ;;  %v228_v19 = vld [vmem:[%s3014_s11 + $0xc] sm:$0xf] }
  0x26   : > { %v272_v34 = vor.u32 %v271_v24, %v267_v23  ;;  %v330_v35 = vrot.slane %v328_v26, 4  ;;  %v337_v36 = vshll.u32 %v3076_v21, 16  ;;  %v341_v37 = vshrl.u32 %v3076_v21, 16 }
  0x27   : > { %v472_v38 = vpack.c.b16 %v463_v27, %v462_v12  ;;  %v263_v39 = vrot.slane %v262_v28, 4  ;;  %v333_v40 = vrot.slane %v331_v32, 5  ;;  %v347_v42 = vshll.u32 %v3081_v25, 16  ;;  %v2846_v12 = vld [vmem:[%s3822_s1 + $0x30] sm:$0xff] }
  0x28   : > { %v273_v43 = vrot.slane %v272_v34, 4  ;;  %v339_v44 = vrot.slane %v337_v36, 5  ;;  %v343_v45 = vrot.slane %v341_v37, 4  ;;  %v376_v47 = vshrl.u32 %v236_v33, 16  ;;  %1684 = vmatpush.bf16.msra.mxu2 %v2846_v12  ;;  %v3149_v12 = vld [vmem:[%s3014_s11 + $0x10] sm:$0xf] }
  0x29   : > { %2481 = vmatmul.msk.bf16.vlgmr.msra.gmra.mxu3 %vm480_vm2, %v472_v38  ;;  %v268_v48 = vsel %vm3042_vm3, %v263_v39, %v267_v23  ;;  %v334_v49 = vor.u32 %v333_v40, %v330_v35  ;;  %v349_v50 = vrot.slane %v347_v42, 5  ;;  %v379_v52 = vshll.u32 %v236_v33, 16  ;;  %v3122_v33 = vld [vmem:[%s3014_s11 + $0x10] sm:$0xf]  ;;  %v2847_v38 = vld [vmem:[%s3822_s1 + $0x38] sm:$0xff]  ;;  %v2837_v39 = vld [vmem:[%s3822_s1 + $0x28] sm:$0xff] }
  0x2a   : > { %v278_v54 = vsel %vm3042_vm3, %v273_v43, %v277_v29  ;;  %v450_v55 = vunpack.c.l.b16 %v268_v48  ;;  %v344_v56 = vor.u32 %v343_v45, %v339_v44  ;;  %v378_v57 = vrot.slane %v376_v47, 4  ;;  %v2848_v40 = vld [vmem:[%s3822_s1 + $0x40] sm:$0xff]  ;;  %v3136_v47 = vld [vmem:[%s3014_s11 + $0x14] sm:$0x1]  ;;  %2022 = vmatpush.bf16.msra.mxu3 %v2847_v38  ;;  %1526 = vmatpush.bf16.msra.mxu1 %v2837_v39 }
  0x2b   : > { %v451_v58 = vunpack.c.l.b16 %v278_v54  ;;  %v335_v59 = vrot.slane %v334_v49, 4  ;;  %v381_v60 = vrot.slane %v379_v52, 5  ;;  %v385_v62 = vshll.u32 %v3089_v46, 16 }
  0x2c   : > { %v345_v63 = vrot.slane %v344_v56, 4  ;;  %v389_v0 = vshrl.u32 %v3089_v46, 16  ;;  %v395_v1 = vshll.u32 %v3095_v51, 16  ;;  %v424_v2 = vshrl.u32 %v240_v53, 16 }
  0x2d   : > { %v466_v4 = vpack.c.b16 %v451_v58, %v450_v55  ;;  %v340_v5 = vsel %vm3042_vm3, %v335_v59, %v339_v44  ;;  %v382_v8 = vor.u32 %v381_v60, %v378_v57  ;;  %v387_v9 = vrot.slane %v385_v62, 5 }
  0x2e   : > { %v350_v13 = vsel %vm3042_vm3, %v345_v63, %v349_v50  ;;  %v456_v16 = vunpack.c.l.b16 %v340_v5  ;;  %v391_v17 = vrot.slane %v389_v0, 4  ;;  %v397_v18 = vrot.slane %v395_v1, 5  ;;  %v673_v1 = vld [vmem:[%s3014_s11] sm:$0xe] }
  0x2f   : > { %2475 = vmatmul.msk.bf16.vlgmr.msra.gmra.mxu0 %vm480_vm2, %v466_v4  ;;  %v457_v22 = vunpack.c.l.b16 %v350_v13  ;;  %v383_v23 = vrot.slane %v382_v8, 4  ;;  %v426_v24 = vrot.slane %v424_v2, 4  ;;  %v427_v26 = vshll.u32 %v240_v53, 16 }
  0x30   : > { %v392_v27 = vor.u32 %v391_v17, %v387_v9  ;;  %v433_v28 = vshll.u32 %v3106_v10, 16  ;;  %v437_v29 = vshrl.u32 %v3106_v10, 16  ;;  %v443_v32 = vshll.u32 %v3109_v11, 16  ;;  %2232 = vmatpush.bf16.msra.mxu0 %v2848_v40 }
  0x31   : > { %v469_v34 = vpack.c.b16 %v457_v22, %v456_v16  ;;  %v388_v35 = vsel %vm3042_vm3, %v383_v23, %v387_v9  ;;  %v429_v36 = vrot.slane %v427_v26, 5  ;;  %v280_v37 = vshrl.u32 %v228_v19, 16  ;;  %v2613_v9 = vld [vmem:[%s3014_s11 + $0xc] sm:$0xf] }
  0x32   : > { %v393_v42 = vrot.slane %v392_v27, 4  ;;  %v460_v43 = vunpack.c.l.b16 %v388_v35  ;;  %v435_v44 = vrot.slane %v433_v28, 5  ;;  %v439_v45 = vrot.slane %v437_v29, 4 }
  0x33   : > { %2478 = vmatmul.msk.bf16.gmra.mxu1 %vm480_vm2, %v469_v34  ;;  %v430_v48 = vor.u32 %v429_v36, %v426_v24  ;;  %v445_v49 = vrot.slane %v443_v32, 5  ;;  %v282_v50 = vrot.slane %v280_v37, 4  ;;  %v283_v52 = vshll.u32 %v228_v19, 16  ;;  %v3164_v36 = vld [vmem:[%s3014_s11 + $0x14] sm:$0x1] }
  0x34   : > { %v398_v53 = vsel %vm3042_vm3, %v393_v42, %v397_v18  ;;  %v440_v54 = vor.u32 %v439_v45, %v435_v44  ;;  %v289_v55 = vshll.u32 %v3122_v33, 16  ;;  %v293_v56 = vshrl.u32 %v3122_v33, 16 }
  0x35   : > { %v461_v57 = vunpack.c.l.b16 %v398_v53  ;;  %v431_v58 = vrot.slane %v430_v48, 4  ;;  %v285_v59 = vrot.slane %v283_v52, 5  ;;  %v299_v60 = vshll.u32 %v3136_v47, 16 }
  0x36   : > { %v441_v62 = vrot.slane %v440_v54, 4  ;;  %v291_v63 = vrot.slane %v289_v55, 5  ;;  %v295_v0 = vrot.slane %v293_v56, 4  ;;  %v2527_v22 = vrot.slane %v673_v1, 9 }
  0x37   : > { %v471_v2 = vpack.c.b16 %v461_v57, %v460_v43  ;;  %v436_v4 = vsel %vm3042_vm3, %v431_v58, %v435_v44  ;;  %v286_v5 = vor.u32 %v285_v59, %v282_v50  ;;  %v301_v8 = vrot.slane %v299_v60, 5  ;;  %v2816_v50 = vld [vmem:[%s3014_s11] sm:$0xff]  ;;  %v675_v59 = vld [vmem:[%s3014_s11 + $0x18] sm:$0xe] }
  0x38   : > { %v446_v13 = vsel %vm3042_vm3, %v441_v62, %v445_v49  ;;  %v464_v16 = vunpack.c.l.b16 %v436_v4  ;;  %v296_v17 = vor.u32 %v295_v0, %v291_v63  ;;  %v702_v23 = vrot.slane %v3060_v61, 5  ;;  %v674_v62 = vld [vmem:[%s3014_s11 + $0xc] sm:$0xe] }
  0x39   : > { %2480 = vmatmul.msk.bf16.gmra.mxu2 %vm480_vm2, %v471_v2  ;;  %v465_v18 = vunpack.c.l.b16 %v446_v13  ;;  %v287_v19 = vrot.slane %v286_v5, 4  ;;  %v1061_v27 = vshrl.u32 %v2613_v9, 16  ;;  %v1064_v28 = vshll.u32 %v2613_v9, 16 }
  0x3a   : > { %v297_v24 = vrot.slane %v296_v17, 4  ;;  %v1070_v29 = vshll.u32 %v3149_v12, 16  ;;  %v704_v35 = vrot.slane %v702_v23, 4  ;;  %v703_v40 = vsel %vm3156_vm6, %v2527_v22, %v702_v23 }
  0x3b   : > { %v473_v32 = vpack.c.b16 %v465_v18, %v464_v16  ;;  %v292_v34 = vsel %vm3042_vm3, %v287_v19, %v291_v63  ;;  %v1063_v38 = vrot.slane %v1061_v27, 4  ;;  %v1066_v42 = vrot.slane %v1064_v28, 5  ;;  %v2827_v27 = vld [vmem:[%s3014_s11 + $0xc] sm:$0xff] }
  0x3c   : > { %v302_v61 = vsel %vm3042_vm3, %v297_v24, %v301_v8  ;;  %v452_v37 = vunpack.c.l.b16 %v292_v34  ;;  %v706_v43 = vsel %vm3156_vm6, %v704_v35, %v705_v20  ;;  %v1072_v44 = vrot.slane %v1070_v29, 5  ;;  %v3181_v20 = vld [vmem:[%s3014_s11 + $0x1c] sm:$0xf] }
  0x3d   : > { %2482 = vmatmul.msk.bf16.gmra.mxu3 %vm480_vm2, %v473_v32  ;;  %v453_v39 = vunpack.c.l.b16 %v302_v61  ;;  %v1074_v45 = vshrl.u32 %v3149_v12, 16  ;;  %v1080_v48 = vshll.u32 %v3164_v36, 16  ;;  %v1067_v52 = vor.u32 %v1066_v42, %v1063_v38 }
  0x3e   : > { %v759_v54 = vunpack.c.l.b16 %v703_v40  ;;  %v760_v55 = vunpack.c.l.b16 %v706_v43  ;;  %v709_v63 = vrot.slane %v3122_v33, 5  ;;  %v1085_v0 = vshrl.u32 %v2616_v3, 16 }
  0x3f   : > { %v467_v49 = vpack.c.b16 %v453_v39, %v452_v37  ;;  %v1076_v53 = vrot.slane %v1074_v45, 4  ;;  %v1068_v56 = vrot.slane %v1067_v52, 4  ;;  %v1082_v58 = vrot.slane %v1080_v48, 5  ;;  %v2817_v45 = vld [vmem:[%s3014_s11 + $0xc] sm:$0xff] }
  0x40   : > { %v775_v1 = vpack.c.b16 %v760_v55, %v759_v54  ;;  %v1088_v2 = vshll.u32 %v2616_v3, 16  ;;  %v1094_v4 = vshll.u32 %v3181_v20, 16  ;;  %v2529_v5 = vrot.slane %v675_v59, 9  ;;  %v2619_v54 = vld [vmem:[%s3014_s11 + $0x24] sm:$0xf] }
  0x41   : > { %2476 = vmatmul.msk.bf16.gmra.mxu0 %vm480_vm2, %v467_v49  ;;  %v1077_v57 = vor.u32 %v1076_v53, %v1072_v44  ;;  %v1073_v8 = vsel %vm3042_vm3, %v1068_v56, %v1072_v44  ;;  %v1098_v13 = vshrl.u32 %v3181_v20, 16  ;;  %v716_v16 = vrot.slane %v3018_v6, 5  ;;  %v3216_v55 = vld [vmem:[%s3014_s11 + $0x28] sm:$0xf]  ;;  %v676_v3 = vld [vmem:[%s3014_s11 + $0x24] sm:$0xe] }
  0x42   : > { %v2528_v17 = vrot.slane %v674_v62, 9  ;;  %v712_v33 = vrot.slane %v3136_v47, 5  ;;  %v719_v18 = vrot.slane %v3021_v7, 5  ;;  %v711_v19 = vrot.slane %v709_v63, 4  ;;  %v3203_v7 = vld [vmem:[%s3014_s11 + $0x20] sm:$0x1] }
  0x43   : > { %2519 = vmatmul.msk.bf16.vlgmr.msrb.gmra.mxu1 %vm480_vm2, %v2816_v50  ;;  %v1078_v60 = vrot.slane %v1077_v57, 4  ;;  %v1087_v22 = vrot.slane %v1085_v0, 4  ;;  %v717_v23 = vsel %vm3156_vm6, %v2529_v5, %v716_v16  ;;  %v718_v24 = vrot.slane %v716_v16, 4 }
  0x44   : > { %v1255_v28 = vunpack.c.l.b16 %v1073_v8  ;;  %v1090_v32 = vrot.slane %v1088_v2, 5  ;;  %v763_v6 = vunpack.c.l.b16 %v717_v23  ;;  %v1096_v34 = vrot.slane %v1094_v4, 5  ;;  %v3234_v23 = vld [vmem:[%s3014_s11 + $0x2c] sm:$0x1] }
  0x45   : > { %v1083_v9 = vsel %vm3042_vm3, %v1078_v60, %v1082_v58  ;;  %v1100_v35 = vrot.slane %v1098_v13, 4  ;;  %v720_v47 = vsel %vm3156_vm6, %v718_v24, %v719_v18  ;;  %v710_v37 = vsel %vm3156_vm6, %v2528_v17, %v709_v63 }
  0x46   : > { %v1256_v29 = vunpack.c.l.b16 %v1083_v9  ;;  %v764_v61 = vunpack.c.l.b16 %v720_v47  ;;  %v713_v39 = vsel %vm3156_vm6, %v711_v19, %v712_v33  ;;  %v1091_v40 = vor.u32 %v1090_v32, %v1087_v22  ;;  %v2828_v9 = vld [vmem:[%s3014_s11 + $0x18] sm:$0xff] }
  0x47   : > { %v1101_v43 = vor.u32 %v1100_v35, %v1096_v34  ;;  %v1104_v44 = vshll.u32 %v3203_v7, 16  ;;  %v761_v48 = vunpack.c.l.b16 %v710_v37  ;;  %v762_v49 = vunpack.c.l.b16 %v713_v39  ;;  %v2818_v32 = vld [vmem:[%s3014_s11 + $0x18] sm:$0xff] }
  0x48   : > { %v1271_v38 = vpack.c.b16 %v1256_v29, %v1255_v28  ;;  %v777_v42 = vpack.c.b16 %v764_v61, %v763_v6  ;;  %v1092_v50 = vrot.slane %v1091_v40, 4  ;;  %v723_v56 = vrot.slane %v3076_v21, 5  ;;  %v2622_v6 = vld [vmem:[%s3014_s11 + $0x30] sm:$0xf] }
  0x49   : > { %2541 = vmatmul.msk.bf16.vlgmr.msrb.gmra.mxu2 %vm480_vm2, %v775_v1  ;;  %v1102_v52 = vrot.slane %v1101_v43, 4  ;;  %v1106_v53 = vrot.slane %v1104_v44, 5  ;;  %v726_v57 = vrot.slane %v3081_v25, 5  ;;  %v776_v58 = vpack.c.b16 %v762_v49, %v761_v48 }
  0x4a   : > { %v2530_v59 = vrot.slane %v676_v3, 9  ;;  %v1097_v60 = vsel %vm3042_vm3, %v1092_v50, %v1096_v34  ;;  %v1109_v62 = vshrl.u32 %v2619_v54, 16  ;;  %v1112_v63 = vshll.u32 %v2619_v54, 16  ;;  %v3242_v34 = vld [vmem:[%s3014_s11 + $0x34] sm:$0xf] }
  0x4b   : > { %v725_v0 = vrot.slane %v723_v56, 4  ;;  %v1107_v1 = vsel %vm3042_vm3, %v1102_v52, %v1106_v53  ;;  %v1118_v2 = vshll.u32 %v3216_v55, 16  ;;  %v1122_v4 = vshrl.u32 %v3216_v55, 16  ;;  %v2829_v52 = vld [vmem:[%s3014_s11 + $0x24] sm:$0xff]  ;;  %v3254_v3 = vld [vmem:[%s3014_s11 + $0x38] sm:$0x1] }
  0x4c   : > { %v724_v21 = vsel %vm3156_vm6, %v2530_v59, %v723_v56  ;;  %v1257_v13 = vunpack.c.l.b16 %v1097_v60  ;;  %v1258_v16 = vunpack.c.l.b16 %v1107_v1  ;;  %v1111_v17 = vrot.slane %v1109_v62, 4  ;;  %v2819_v60 = vld [vmem:[%s3014_s11 + $0x24] sm:$0xff]  ;;  %v3262_v1 = vld [vmem:[%s3014_s11 + $0x40] sm:$0xf] }
  0x4d   : > { %2605 = vmatmul.msk.bf16.vlgmr.msrb.gmra.mxu3 %vm480_vm2, %v2827_v27  ;;  %v727_v25 = vsel %vm3156_vm6, %v725_v0, %v726_v57  ;;  %v765_v5 = vunpack.c.l.b16 %v724_v21  ;;  %v1114_v33 = vrot.slane %v1112_v63, 5  ;;  %v1120_v18 = vrot.slane %v1118_v2, 5  ;;  %v677_v21 = vld [vmem:[%s3014_s11 + $0x30] sm:$0xe] }
  0x4e   : > { %v766_v8 = vunpack.c.l.b16 %v727_v25  ;;  %v1124_v19 = vrot.slane %v1122_v4, 4  ;;  %v1272_v24 = vpack.c.b16 %v1258_v16, %v1257_v13  ;;  %v1128_v29 = vshll.u32 %v3234_v23, 16 }
  0x4f   : > { %v1115_v27 = vor.u32 %v1114_v33, %v1111_v17  ;;  %v1133_v37 = vshrl.u32 %v2622_v6, 16  ;;  %v1142_v39 = vshll.u32 %v3242_v34, 16  ;;  %v1146_v40 = vshrl.u32 %v3242_v34, 16 }
  0x50   : > { %v778_v22 = vpack.c.b16 %v766_v8, %v765_v5  ;;  %v1125_v28 = vor.u32 %v1124_v19, %v1120_v18  ;;  %v1130_v61 = vrot.slane %v1128_v29, 5  ;;  %v1166_v8 = vshll.u32 %v3262_v1, 16 }
  0x51   : > { %2643 = vmatmul.msk.bf16.vlgmr.msrb.gmra.mxu0 %vm480_vm2, %v1271_v38  ;;  %v1116_v35 = vrot.slane %v1115_v27, 4  ;;  %v1136_v38 = vshll.u32 %v2622_v6, 16  ;;  %v1144_v49 = vrot.slane %v1142_v39, 5  ;;  %v1148_v50 = vrot.slane %v1146_v40, 4  ;;  %v3277_v6 = vld [vmem:[%s3014_s11 + $0x44] sm:$0x1] }
  0x52   : > { %v1126_v47 = vrot.slane %v1125_v28, 4  ;;  %v730_v13 = vrot.slane %v3028_v14, 5  ;;  %v2531_v33 = vrot.slane %v677_v21, 9  ;;  %v1168_v27 = vrot.slane %v1166_v8, 5 }
  0x53   : > { %2520 = vmatmul.msk.bf16.gmra.mxu1 %vm480_vm2, %v2817_v45  ;;  %v1121_v43 = vsel %vm3042_vm3, %v1116_v35, %v1120_v18  ;;  %v1135_v45 = vrot.slane %v1133_v37, 4  ;;  %v1138_v48 = vrot.slane %v1136_v38, 5  ;;  %v1149_v57 = vor.u32 %v1148_v50, %v1144_v49  ;;  %v2830_v18 = vld [vmem:[%s3014_s11 + $0x30] sm:$0xff] }
  0x54   : > { %v1131_v44 = vsel %vm3042_vm3, %v1126_v47, %v1130_v61  ;;  %v1259_v53 = vunpack.c.l.b16 %v1121_v43  ;;  %v732_v29 = vrot.slane %v730_v13, 4  ;;  %v731_v14 = vsel %vm3156_vm6, %v2531_v33, %v730_v13  ;;  %v2820_v38 = vld [vmem:[%s3014_s11 + $0x30] sm:$0xff]  ;;  %v2821_v33 = vld [vmem:[%s3014_s11 + $0x3c] sm:$0xff] }
  0x55   : > { %v1260_v54 = vunpack.c.l.b16 %v1131_v44  ;;  %v1139_v56 = vor.u32 %v1138_v48, %v1135_v45  ;;  %v1150_v63 = vrot.slane %v1149_v57, 4  ;;  %v1176_v61 = vshll.u32 %v3277_v6, 16  ;;  %v2628_v45 = vld [vmem:[%s3014_s11 + $0x48] sm:$0xf]  ;;  %v3290_v48 = vld [vmem:[%s3014_s11 + $0x4c] sm:$0xf] }
  0x56   : > { %v1184_v57 = vshll.u32 %v2628_v45, 16 }
  0x57   : > { %v1273_v59 = vpack.c.b16 %v1260_v54, %v1259_v53  ;;  %v1140_v62 = vrot.slane %v1139_v56, 4  ;;  %v1178_v44 = vrot.slane %v1176_v61, 5  ;;  %v737_v53 = vrot.slane %v3089_v46, 5  ;;  %v678_v54 = vld [vmem:[%s3014_s11 + $0x3c] sm:$0xe] }
  0x58   : > { %v1181_v56 = vshrl.u32 %v2628_v45, 16  ;;  %v1186_v46 = vrot.slane %v1184_v57, 5  ;;  %v3331_v57 = vld [vmem:[%s3014_s11 + $0x5c] sm:$0x1] }
  0x59   : > { %2542 = vmatmul.msk.bf16.gmra.mxu2 %vm480_vm2, %v776_v58  ;;  %v1152_v58 = vshll.u32 %v3254_v3, 16  ;;  %v1145_v2 = vsel %vm3042_vm3, %v1140_v62, %v1144_v49  ;;  %v2831_v62 = vld [vmem:[%s3014_s11 + $0x3c] sm:$0xff] }
  0x5a   : > { %v1261_v16 = vunpack.c.l.b16 %v1145_v2  ;;  %v740_v2 = vrot.slane %v3095_v51, 5 }
  0x5b   : > { %v1154_v0 = vrot.slane %v1152_v58, 5  ;;  %v1190_v58 = vshll.u32 %v3290_v48, 16 }
  0x5d   : > { %2606 = vmatmul.msk.bf16.gmra.mxu3 %vm480_vm2, %v2828_v9  ;;  %v1155_v4 = vsel %vm3042_vm3, %v1150_v63, %v1154_v0  ;;  %v1170_v9 = vshrl.u32 %v3262_v1, 16  ;;  %v2532_v0 = vrot.slane %v678_v54, 9  ;;  %v1192_v21 = vrot.slane %v1190_v58, 5 }
  0x5e   : > { %v1262_v17 = vunpack.c.l.b16 %v1155_v4  ;;  %v1183_v4 = vrot.slane %v1181_v56, 4  ;;  %v747_v54 = vrot.slane %v3047_v41, 5  ;;  %v1224_v41 = vshll.u32 %v3331_v57, 16 }
  0x5f   : > { %v1172_v28 = vrot.slane %v1170_v9, 4  ;;  %v738_v9 = vsel %vm3156_vm6, %v2532_v0, %v737_v53  ;;  %v2822_v0 = vld [vmem:[%s3014_s11 + $0x48] sm:$0xff] }
  0x60   : > { %v1274_v35 = vpack.c.b16 %v1262_v17, %v1261_v16  ;;  %v1187_v16 = vor.u32 %v1186_v46, %v1183_v4 }
  0x61   : > { %2644 = vmatmul.msk.bf16.gmra.mxu0 %vm480_vm2, %v1272_v24  ;;  %v1173_v47 = vor.u32 %v1172_v28, %v1168_v27 }
  0x63   : > { %2521 = vmatmul.msk.bf16.gmra.mxu1 %vm480_vm2, %v2818_v32  ;;  %v733_v32 = vrot.slane %v3031_v15, 5  ;;  %v767_v15 = vunpack.c.l.b16 %v731_v14  ;;  %v1174_v43 = vrot.slane %v1173_v47, 4 }
  0x65   : > { %v734_v37 = vsel %vm3156_vm6, %v732_v29, %v733_v32  ;;  %v3316_v32 = vld [vmem:[%s3014_s11 + $0x58] sm:$0xf] }
  0x66   : > { %v768_v39 = vunpack.c.l.b16 %v734_v37  ;;  %v1214_v47 = vshll.u32 %v3316_v32, 16 }
  0x68   : > { %v779_v49 = vpack.c.b16 %v768_v39, %v767_v15  ;;  %v1218_v15 = vshrl.u32 %v3316_v32, 16  ;;  %v679_v39 = vld [vmem:[%s3014_s11 + $0x48] sm:$0xe] }
  0x69   : > { %2543 = vmatmul.msk.bf16.gmra.mxu2 %vm480_vm2, %v777_v42  ;;  %v2625_v42 = vld [vmem:[%s3014_s11 + $0x3c] sm:$0xf] }
  0x6a   : > { %v1157_v25 = vshrl.u32 %v2625_v42, 16  ;;  %v1160_v5 = vshll.u32 %v2625_v42, 16  ;;  %v739_v42 = vrot.slane %v737_v53, 4  ;;  %v1220_v56 = vrot.slane %v1218_v15, 4 }
  0x6c   : > { %v1159_v19 = vrot.slane %v1157_v25, 4  ;;  %v1162_v24 = vrot.slane %v1160_v5, 5  ;;  %v3304_v5 = vld [vmem:[%s3014_s11 + $0x50] sm:$0x1]  ;;  %v741_v13 = vsel %vm3156_vm6, %v739_v42, %v740_v2 }
  0x6d   : > { %2607 = vmatmul.msk.bf16.gmra.mxu3 %vm480_vm2, %v2829_v52  ;;  %v1179_v52 = vsel %vm3042_vm3, %v1174_v43, %v1178_v44  ;;  %v1200_v51 = vshll.u32 %v3304_v5, 16  ;;  %v2832_v44 = vld [vmem:[%s3014_s11 + $0x48] sm:$0xff] }
  0x6e   : > { %v1264_v63 = vunpack.c.l.b16 %v1179_v52  ;;  %v2533_v52 = vrot.slane %v679_v39, 9  ;;  %v3364_v39 = vld [vmem:[%s3014_s11 + $0x68] sm:$0x1] }
  0x6f   : > { %v1202_v29 = vrot.slane %v1200_v51, 5 }
  0x71   : > { %2645 = vmatmul.msk.bf16.gmra.mxu0 %vm480_vm2, %v1273_v59  ;;  %v1194_v59 = vshrl.u32 %v3290_v48, 16 }
  0x73   : > { %2522 = vmatmul.msk.bf16.gmra.mxu1 %vm480_vm2, %v2819_v60  ;;  %v1196_v25 = vrot.slane %v1194_v59, 4 }
  0x75   : > { %v1197_v17 = vor.u32 %v1196_v25, %v1192_v21  ;;  %v2634_v25 = vld [vmem:[%s3014_s11 + $0x60] sm:$0xf] }
  0x77   : > { %v1198_v28 = vrot.slane %v1197_v17, 4  ;;  %v1232_v17 = vshll.u32 %v2634_v25, 16 }
  0x79   : > { %2544 = vmatmul.msk.bf16.gmra.mxu2 %vm480_vm2, %v778_v22  ;;  %v1163_v22 = vor.u32 %v1162_v24, %v1159_v19  ;;  %v770_v19 = vunpack.c.l.b16 %v741_v13  ;;  %v2631_v24 = vld [vmem:[%s3014_s11 + $0x54] sm:$0xf]  ;;  %v1203_v37 = vsel %vm3042_vm3, %v1198_v28, %v1202_v29 }
  0x7a   : > { %v1208_v14 = vshll.u32 %v2631_v24, 16 }
  0x7b   : > { %v1164_v40 = vrot.slane %v1163_v22, 4 }
  0x7c   : > { %v1210_v43 = vrot.slane %v1208_v14, 5 }
  0x7d   : > { %2608 = vmatmul.msk.bf16.gmra.mxu3 %vm480_vm2, %v2830_v18  ;;  %v1169_v50 = vsel %vm3042_vm3, %v1164_v40, %v1168_v27  ;;  %v769_v18 = vunpack.c.l.b16 %v738_v9  ;;  %v1188_v27 = vrot.slane %v1187_v16, 4  ;;  %v1229_v16 = vshrl.u32 %v2634_v25, 16 }
  0x7e   : > { %v1263_v60 = vunpack.c.l.b16 %v1169_v50  ;;  %v1216_v50 = vrot.slane %v1214_v47, 5  ;;  %v1234_v47 = vrot.slane %v1232_v17, 5 }
  0x7f   : > { %v780_v22 = vpack.c.b16 %v770_v19, %v769_v18  ;;  %v1193_v61 = vsel %vm3042_vm3, %v1188_v27, %v1192_v21  ;;  %v1226_v21 = vrot.slane %v1224_v41, 5  ;;  %v751_v19 = vrot.slane %v3106_v10, 5  ;;  %v680_v27 = vld [vmem:[%s3014_s11 + $0x54] sm:$0xe] }
  0x80   : > { %v1275_v8 = vpack.c.b16 %v1264_v63, %v1263_v60  ;;  %v1265_v45 = vunpack.c.l.b16 %v1193_v61  ;;  %v1221_v63 = vor.u32 %v1220_v56, %v1216_v50  ;;  %v754_v10 = vrot.slane %v3109_v11, 5  ;;  %v2823_v56 = vld [vmem:[%s3014_s11 + $0x54] sm:$0xff] }
  0x81   : > { %2646 = vmatmul.msk.bf16.gmra.mxu0 %vm480_vm2, %v1274_v35  ;;  %v1205_v35 = vshrl.u32 %v2631_v24, 16 }
  0x82   : > { %v1222_v46 = vrot.slane %v1221_v63, 4 }
  0x83   : > { %2523 = vmatmul.msk.bf16.gmra.mxu1 %vm480_vm2, %v2820_v38  ;;  %v744_v38 = vrot.slane %v3038_v30, 5  ;;  %v1207_v40 = vrot.slane %v1205_v35, 4  ;;  %v2833_v35 = vld [vmem:[%s3014_s11 + $0x54] sm:$0xff] }
  0x85   : > { %v746_v53 = vrot.slane %v744_v38, 4  ;;  %v1211_v30 = vor.u32 %v1210_v43, %v1207_v40  ;;  %v745_v60 = vsel %vm3156_vm6, %v2533_v52, %v744_v38  ;;  %v753_v38 = vrot.slane %v751_v19, 4 }
  0x86   : > { %v771_v2 = vunpack.c.l.b16 %v745_v60 }
  0x87   : > { %v1212_v42 = vrot.slane %v1211_v30, 4  ;;  %v755_v52 = vsel %vm3156_vm6, %v753_v38, %v754_v10  ;;  %v2834_v38 = vld [vmem:[%s3014_s11 + $0x60] sm:$0xff] }
  0x88   : > { %v774_v41 = vunpack.c.l.b16 %v755_v52 }
  0x89   : > { %2545 = vmatmul.msk.bf16.gmra.mxu2 %vm480_vm2, %v779_v49  ;;  %v1266_v49 = vunpack.c.l.b16 %v1203_v37  ;;  %v1217_v9 = vsel %vm3042_vm3, %v1212_v42, %v1216_v50  ;;  %v2534_v37 = vrot.slane %v680_v27, 9 }
  0x8a   : > { %v1267_v28 = vunpack.c.l.b16 %v1217_v9  ;;  %v1411_v9 = vrot.slane %v3164_v36, 5 }
  0x8b   : > { %v1276_v58 = vpack.c.b16 %v1266_v49, %v1265_v45  ;;  %v2745_v49 = vld [vmem:[%s3014_s11 + $0x18] sm:$0xf]  ;;  %v752_v50 = vsel %vm3156_vm6, %v2534_v37, %v751_v19 }
  0x8c   : > { %v1767_v60 = vshrl.u32 %v2745_v49, 16  ;;  %v773_v63 = vunpack.c.l.b16 %v752_v50 }
  0x8d   : > { %2609 = vmatmul.msk.bf16.gmra.mxu3 %vm480_vm2, %v2831_v62  ;;  %v748_v62 = vsel %vm3156_vm6, %v746_v53, %v747_v54  ;;  %v1248_v53 = vshll.u32 %v3364_v39, 16  ;;  %v3378_v54 = vld [vmem:[%s3014_s11 + $0x1c] sm:$0xf] }
  0x8e   : > { %v772_v4 = vunpack.c.l.b16 %v748_v62  ;;  %v1770_v62 = vshll.u32 %v2745_v49, 16  ;;  %v1776_v42 = vshll.u32 %v3378_v54, 16  ;;  %v1769_v17 = vrot.slane %v1767_v60, 4 }
  0x8f   : > { %v1250_v25 = vrot.slane %v1248_v53, 5  ;;  %v2114_v60 = vrot.slane %v3378_v54, 5 }
  0x90   : > { %v781_v13 = vpack.c.b16 %v772_v4, %v771_v2  ;;  %v1780_v2 = vshrl.u32 %v3378_v54, 16  ;;  %v1778_v19 = vrot.slane %v1776_v42, 5 }
  0x91   : > { %2647 = vmatmul.msk.bf16.gmra.mxu0 %vm480_vm2, %v1275_v8  ;;  %v3345_v8 = vld [vmem:[%s3014_s11 + $0x64] sm:$0xf] }
  0x92   : > { %v1238_v51 = vshll.u32 %v3345_v8, 16  ;;  %v1242_v24 = vshrl.u32 %v3345_v8, 16 }
  0x93   : > { %2524 = vmatmul.msk.bf16.gmra.mxu1 %vm480_vm2, %v2821_v33  ;;  %v1227_v33 = vsel %vm3042_vm3, %v1222_v46, %v1226_v21 }
  0x94   : > { %v1268_v14 = vunpack.c.l.b16 %v1227_v33  ;;  %v1240_v61 = vrot.slane %v1238_v51, 5  ;;  %v1244_v15 = vrot.slane %v1242_v24, 4  ;;  %v1772_v51 = vrot.slane %v1770_v62, 5 }
  0x95   : > { %v782_v33 = vpack.c.b16 %v774_v41, %v773_v63  ;;  %v1782_v24 = vrot.slane %v1780_v2, 4  ;;  %v2748_v41 = vld [vmem:[%s3014_s11 + $0x24] sm:$0xf] }
  0x96   : > { %v1245_v11 = vor.u32 %v1244_v15, %v1240_v61  ;;  %v1773_v37 = vor.u32 %v1772_v51, %v1769_v17  ;;  %v2652_v17 = vld [vmem:[%s3014_s11 + $0x18] sm:$0xe]  ;;  %v1791_v51 = vshrl.u32 %v2748_v41, 16 }
  0x97   : > { %v1783_v15 = vor.u32 %v1782_v24, %v1778_v19 }
  0x98   : > { %v1246_v21 = vrot.slane %v1245_v11, 4  ;;  %v1774_v52 = vrot.slane %v1773_v37, 4 }
  0x99   : > { %2546 = vmatmul.msk.bf16.gmra.mxu2 %vm480_vm2, %v780_v22  ;;  %v1231_v22 = vrot.slane %v1229_v16, 4  ;;  %v1784_v53 = vrot.slane %v1783_v15, 4 }
  0x9a   : > { %v1251_v36 = vsel %vm3042_vm3, %v1246_v21, %v1250_v25  ;;  %v1415_v25 = vrot.slane %v3181_v20, 5 }
  0x9b   : > { %v1235_v45 = vor.u32 %v1234_v47, %v1231_v22 }
  0x9d   : > { %2610 = vmatmul.msk.bf16.gmra.mxu3 %vm480_vm2, %v2832_v44  ;;  %v1277_v44 = vpack.c.b16 %v1268_v14, %v1267_v28  ;;  %v1236_v46 = vrot.slane %v1235_v45, 4 }
  0x9e   : > { %v3334_v59 = vpop.f32.mrf.mxu1 }
  0x9f   : > { %v1241_v28 = vsel %vm3042_vm3, %v1236_v46, %v1240_v61  ;;  %v1270_v61 = vunpack.c.l.b16 %v1251_v36  ;;  %v1779_v46 = vsel %vm3042_vm3, %v1774_v52, %v1778_v19  ;;  %v1417_v36 = vrot.slane %v1415_v25, 4 }
  0xa0   : > { %v1269_v10 = vunpack.c.l.b16 %v1241_v28  ;;  %v2660_v28 = vrot.slane %v2652_v17, 9 }
  0xa1   : > { %2648 = vmatmul.msk.bf16.gmra.mxu0 %vm480_vm2, %v1276_v58  ;;  %v1408_v58 = vrot.slane %v3149_v12, 5 }
  0xa2   : > { %v1278_v11 = vpack.c.b16 %v1270_v61, %v1269_v10  ;;  %v1793_v61 = vrot.slane %v1791_v51, 4 }
  0xa3   : > { %2525 = vmatmul.msk.bf16.gmra.mxu1 %vm480_vm2, %v2822_v0  ;;  %v2651_v0 = vld [vmem:[%s3014_s11 + $0xc] sm:$0xe]  ;;  %v1410_v16 = vrot.slane %v1408_v58, 4 }
  0xa5   : > { %v1412_v47 = vsel %vm3156_vm6, %v1410_v16, %v1411_v9 }
  0xa6   : > { %v3353_v18 = vpop.f32.mrf.mxu1  ;;  %v1466_v49 = vunpack.c.l.b16 %v1412_v47  ;;  %v1961_v47 = vunpack.c.l.b16 %v1779_v46 }
  0xa8   : > { %v3358_v29 = vpop.f32.mrf.mxu2 }
  0xa9   : > { %2547 = vmatmul.msk.bf16.gmra.mxu2 %vm480_vm2, %v781_v13  ;;  %v2659_v13 = vrot.slane %v2651_v0, 9  ;;  %v3418_v0 = vld [vmem:[%s3014_s11 + $0x28] sm:$0xf] }
  0xaa   : > { %v1800_v24 = vshll.u32 %v3418_v0, 16  ;;  %v1804_v19 = vshrl.u32 %v3418_v0, 16 }
  0xab   : > { %v1409_v22 = vsel %vm3156_vm6, %v2659_v13, %v1408_v58  ;;  %v2783_v58 = vld [vmem:[%s3014_s11 + $0x18] sm:$0xe]  ;;  %v2116_v13 = vrot.slane %v2114_v60, 4 }
  0xac   : > { %v3366_v40 = vpop.f32.mrf.mxu0  ;;  %v3368_v43 = vpop.f32.mrf.mxu3  ;;  %v1465_v45 = vunpack.c.l.b16 %v1409_v22  ;;  %v2791_v21 = vrot.slane %v2783_v58, 9  ;;  %v2838_v22 = vld [vmem:[%s3014_s11 + $0x18] sm:$0xff] }
  0xad   : > { %2611 = vmatmul.msk.bf16.gmra.mxu3 %vm480_vm2, %v2833_v35  ;;  %v2747_v35 = vld [vmem:[%s3014_s11 + $0x20] sm:$0x1] }
  0xae   : > { %v1481_v63 = vpack.c.b16 %v1466_v49, %v1465_v45  ;;  %v2117_v16 = vrot.slane %v2747_v35, 5  ;;  %v1806_v45 = vrot.slane %v1804_v19, 4  ;;  %v3444_v49 = vld [vmem:[%s3014_s11 + $0x2c] sm:$0x1] }
  0xaf   : > { %v1810_v46 = vshll.u32 %v3444_v49, 16 }
  0xb0   : > { %v3381_v30 = vpop.f32.mrf.mxu1  ;;  %v3388_v4 = vpop.f32.mrf.mxu2 }
  0xb1   : > { %2649 = vmatmul.msk.bf16.gmra.mxu0 %vm480_vm2, %v1277_v44  ;;  %v1786_v44 = vshll.u32 %v2747_v35, 16  ;;  %v2115_v35 = vsel %vm3156_vm6, %v2791_v21, %v2114_v60 }
  0xb2   : > { %v2171_v58 = vunpack.c.l.b16 %v2115_v35 }
  0xb3   : > { %2526 = vmatmul.msk.bf16.gmra.mxu1 %vm480_vm2, %v2823_v56  ;;  %v1788_v56 = vrot.slane %v1786_v44, 5  ;;  %v1802_v44 = vrot.slane %v1800_v24, 5 }
  0xb4   : > { %v3392_v12 = vpop.f32.mrf.mxu0  ;;  %v3394_v27 = vpop.f32.mrf.mxu3 }
  0xb5   : > { %v1789_v9 = vsel %vm3042_vm3, %v1784_v53, %v1788_v56 }
  0xb6   : > { %v1962_v37 = vunpack.c.l.b16 %v1789_v9 }
  0xb8   : > { %v3401_v14 = vpop.f32.mrf.mxu1  ;;  %v1977_v56 = vpack.c.b16 %v1962_v37, %v1961_v47 }
  0xb9   : > { %2548 = vmatmul.msk.bf16.gmra.mxu2 %vm480_vm2, %v782_v33  ;;  %v1794_v33 = vshll.u32 %v2748_v41, 16 }
  0xbb   : > { %v1796_v15 = vrot.slane %v1794_v33, 5  ;;  %v3459_v33 = vld [vmem:[%s3014_s11 + $0x34] sm:$0xf] }
  0xbc   : > { %v3409_v50 = vpop.f32.mrf.mxu2 }
  0xbd   : > { %2612 = vmatmul.msk.bf16.gmra.mxu3 %vm480_vm2, %v2834_v38  ;;  %v2118_v38 = vsel %vm3156_vm6, %v2116_v13, %v2117_v16  ;;  %v1797_v41 = vor.u32 %v1796_v15, %v1793_v61  ;;  %v2784_v16 = vld [vmem:[%s3014_s11 + $0x24] sm:$0xe]  ;;  %v1422_v61 = vrot.slane %v3216_v55, 5  ;;  %v1824_v15 = vshll.u32 %v3459_v33, 16 }
  0xbe   : > { %v3414_v62 = vpop.f32.mrf.mxu0  ;;  %v2172_v60 = vunpack.c.l.b16 %v2118_v38 }
  0xbf   : > { %v1798_v19 = vrot.slane %v1797_v41, 4 }
  0xc0   : > { %v3420_v42 = vpop.f32.mrf.mxu3  ;;  %v633_v2 = vpop.f32.mrf.mxu1  ;;  %v2187_v17 = vpack.c.b16 %v2172_v60, %v2171_v58  ;;  %v2124_v58 = vrot.slane %v3444_v49, 5 }
  0xc1   : > { %2650 = vmatmul.msk.bf16.gmra.mxu0 %vm480_vm2, %v1278_v11  ;;  %v634_v54 = vadd.f32 %v633_v2, %v3366_v40  ;;  %v1418_v40 = vrot.slane %v3203_v7, 5  ;;  %v1416_v11 = vsel %vm3156_vm6, %v2660_v28, %v1415_v25  ;;  %v1807_v2 = vor.u32 %v1806_v45, %v1802_v44  ;;  %v2751_v25 = vld [vmem:[%s3014_s11 + $0x30] sm:$0xf] }
  0xc2   : > { %v1467_v21 = vunpack.c.l.b16 %v1416_v11  ;;  %v1815_v47 = vshrl.u32 %v2751_v25, 16  ;;  %v1818_v37 = vshll.u32 %v2751_v25, 16  ;;  %v1425_v45 = vrot.slane %v3234_v23, 5 }
  0xc3   : > { %2673 = vmatmul.msk.bf16.vlgmr.msra.gmra.mxu1 %vm480_vm2, %v1481_v63  ;;  %v1419_v53 = vsel %vm3156_vm6, %v1417_v36, %v1418_v40  ;;  %v1808_v28 = vrot.slane %v1807_v2, 4  ;;  %v2121_v36 = vrot.slane %v3418_v0, 5  ;;  %v2653_v0 = vld [vmem:[%s3014_s11 + $0x24] sm:$0xe] }
  0xc4   : > { %v3433_v20 = vpop.f32.mrf.mxu2  ;;  %v1468_v9 = vunpack.c.l.b16 %v1419_v53  ;;  %v1803_v53 = vsel %vm3042_vm3, %v1798_v19, %v1802_v44  ;;  %v1817_v60 = vrot.slane %v1815_v47, 4  ;;  %v1820_v41 = vrot.slane %v1818_v37, 5 }
  0xc5   : > { %v2123_v55 = vrot.slane %v2121_v36, 4  ;;  %v1826_v44 = vrot.slane %v1824_v15, 5  ;;  %v1963_v25 = vunpack.c.l.b16 %v1803_v53 }
  0xc6   : > { %v3441_v10 = vpop.f32.mrf.mxu0  ;;  %v1482_v40 = vpack.c.b16 %v1468_v9, %v1467_v21  ;;  %v1424_v21 = vrot.slane %v1422_v61, 4 }
  0xc7   : > { %v2125_v19 = vsel %vm3156_vm6, %v2123_v55, %v2124_v58  ;;  %v2785_v58 = vld [vmem:[%s3014_s11 + $0x30] sm:$0xe] }
  0xc8   : > { %v3446_v52 = vpop.f32.mrf.mxu3  ;;  %v635_v7 = vpop.f32.mrf.mxu1 }
  0xc9   : > { %2737 = vmatmul.msk.bf16.vlgmr.msra.gmra.mxu2 %vm480_vm2, %v2838_v22  ;;  %v636_v63 = vadd.f32 %v635_v7, %v3392_v12  ;;  %v1812_v12 = vrot.slane %v1810_v46, 5  ;;  %v2792_v22 = vrot.slane %v2784_v16, 9  ;;  %v2661_v46 = vrot.slane %v2653_v0, 9  ;;  %v2839_v16 = vld [vmem:[%s3014_s11 + $0x24] sm:$0xff] }
  0xcb   : > { %v2122_v23 = vsel %vm3156_vm6, %v2792_v22, %v2121_v36  ;;  %v1426_v22 = vsel %vm3156_vm6, %v1424_v21, %v1425_v45 }
  0xcc   : > { %v822_v13 = vpop.f32.mrf.mxu2 }
  0xcd   : > { %2775 = vmatmul.msk.bf16.vlgmr.msra.gmra.mxu3 %vm480_vm2, %v1977_v56  ;;  %v862_v51 = vadd.f32 %v822_v13, %v634_v54  ;;  %v1828_v54 = vshrl.u32 %v3459_v33, 16  ;;  %v1813_v56 = vsel %vm3042_vm3, %v1808_v28, %v1812_v12  ;;  %v2173_v28 = vunpack.c.l.b16 %v2122_v23 }
  0xce   : > { %v1318_v24 = vpop.f32.mrf.mxu0  ;;  %v1821_v12 = vor.u32 %v1820_v41, %v1817_v60  ;;  %v2128_v41 = vrot.slane %v3459_v33, 5 }
  0xcf   : > { %v1830_v9 = vrot.slane %v1828_v54, 4 }
  0xd0   : > { %v980_v35 = vpop.f32.mrf.mxu3  ;;  %v638_v38 = vpop.f32.mrf.mxu1 }
  0xd1   : > { %2805 = vmatmul.msk.bf16.vlgmr.msra.gmra.mxu0 %vm480_vm2, %v2187_v17  ;;  %v1020_v7 = vadd.f32 %v980_v35, %v862_v51  ;;  %v639_v11 = vadd.f32 %v638_v38, %v3414_v62  ;;  %v1964_v17 = vunpack.c.l.b16 %v1813_v56  ;;  %v3481_v51 = vld [vmem:[%s3014_s11 + $0x38] sm:$0x1]  ;;  %v2174_v38 = vunpack.c.l.b16 %v2125_v19 }
  0xd2   : > { %v1834_v47 = vshll.u32 %v3481_v51, 16 }
  0xd3   : > { %2674 = vmatmul.msk.bf16.gmra.mxu1 %vm480_vm2, %v1482_v40  ;;  %v3477_v62 = vadd.f32 %v1318_v24, %v1020_v7  ;;  %v1423_v40 = vsel %vm3156_vm6, %v2661_v46, %v1422_v61  ;;  %v1978_v35 = vpack.c.b16 %v1964_v17, %v1963_v25  ;;  %v1470_v7 = vunpack.c.l.b16 %v1426_v22  ;;  %v3499_v46 = vld [vmem:[%s3014_s11 + $0x40] sm:$0xf] }
  0xd4   : > { %v824_v2 = vpop.f32.mrf.mxu2  ;;  %v1469_v54 = vunpack.c.l.b16 %v1423_v40  ;;  %v1822_v61 = vrot.slane %v1821_v12, 4  ;;  %v1836_v56 = vrot.slane %v1834_v47, 5  ;;  %v2188_v45 = vpack.c.b16 %v2174_v38, %v2173_v28  ;;  %v2840_v38 = vld [vmem:[%s3014_s11 + $0x30] sm:$0xff] }
  0xd5   : > { %v863_v13 = vadd.f32 %v824_v2, %v636_v63  ;;  %v1831_v63 = vor.u32 %v1830_v9, %v1826_v44  ;;  %v2754_v2 = vld [vmem:[%s3014_s11 + $0x3c] sm:$0xf]  ;;  %v1429_v25 = vrot.slane %v3242_v34, 5  ;;  %v2130_v12 = vrot.slane %v2128_v41, 4 }
  0xd6   : > { %v1320_v49 = vpop.f32.mrf.mxu0  ;;  %v1839_v19 = vshrl.u32 %v2754_v2, 16  ;;  %v1842_v28 = vshll.u32 %v2754_v2, 16  ;;  %v1432_v40 = vrot.slane %v3254_v3, 5 }
  0xd7   : > { %v1832_v53 = vrot.slane %v1831_v63, 4 }
  0xd8   : > { %v982_v36 = vpop.f32.mrf.mxu3  ;;  %v640_v24 = vpop.f32.mrf.mxu1 }
  0xd9   : > { %v1021_v37 = vadd.f32 %v982_v36, %v863_v13  ;;  %2738 = vmatmul.msk.bf16.gmra.mxu2 %vm480_vm2, %v2839_v16  ;;  %v641_v15 = vadd.f32 %v640_v24, %v3441_v10  ;;  %v1483_v10 = vpack.c.b16 %v1470_v7, %v1469_v54  ;;  %v1827_v13 = vsel %vm3042_vm3, %v1822_v61, %v1826_v44 }
  0xda   : > { %v1837_v16 = vsel %vm3042_vm3, %v1832_v53, %v1836_v56  ;;  %v2131_v36 = vrot.slane %v3481_v51, 5  ;;  %v1848_v44 = vshll.u32 %v3499_v46, 16  ;;  %v1852_v24 = vshrl.u32 %v3499_v46, 16  ;;  %v2756_v56 = vld [vmem:[%s3014_s11 + $0x44] sm:$0x1] }
  0xdb   : > { %v3494_v23 = vadd.f32 %v1320_v49, %v1021_v37  ;;  %v2654_v49 = vld [vmem:[%s3014_s11 + $0x30] sm:$0xe]  ;;  %v1966_v63 = vunpack.c.l.b16 %v1837_v16  ;;  %v1431_v37 = vrot.slane %v1429_v25, 4  ;;  %v1841_v54 = vrot.slane %v1839_v19, 4  ;;  %v2786_v19 = vld [vmem:[%s3014_s11 + $0x3c] sm:$0xe] }
  0xdc   : > { %v827_v0 = vpop.f32.mrf.mxu2  ;;  %v2662_v47 = vrot.slane %v2654_v49, 9  ;;  %v1844_v7 = vrot.slane %v1842_v28, 5  ;;  %v2132_v3 = vsel %vm3156_vm6, %v2130_v12, %v2131_v36  ;;  %v1850_v61 = vrot.slane %v1848_v44, 5 }
  0xdd   : > { %2776 = vmatmul.msk.bf16.gmra.mxu3 %vm480_vm2, %v1978_v35  ;;  %v864_v55 = vadd.f32 %v827_v0, %v639_v11  ;;  %v2793_v11 = vrot.slane %v2785_v58, 9  ;;  %v1854_v53 = vrot.slane %v1852_v24, 4  ;;  %v1858_v16 = vshll.u32 %v2756_v56, 16  ;;  %v3533_v24 = vld [vmem:[%s3014_s11 + $0x4c] sm:$0xf] }
  0xde   : > { %v1323_v60 = vpop.f32.mrf.mxu0 }
  0xdf   : > { %v2129_v51 = vsel %vm3156_vm6, %v2793_v11, %v2128_v41  ;;  %v1433_v41 = vsel %vm3156_vm6, %v1431_v37, %v1432_v40  ;;  %v2135_v11 = vrot.slane %v3499_v46, 5  ;;  %v2138_v37 = vrot.slane %v2756_v56, 5 }
  0xe0   : > { %v985_v21 = vpop.f32.mrf.mxu3  ;;  %v643_v9 = vpop.f32.mrf.mxu1  ;;  %v2175_v58 = vunpack.c.l.b16 %v2129_v51  ;;  %v1472_v49 = vunpack.c.l.b16 %v1433_v41 }
  0xe1   : > { %2806 = vmatmul.msk.bf16.gmra.mxu0 %vm480_vm2, %v2188_v45  ;;  %v1022_v17 = vadd.f32 %v985_v21, %v864_v55  ;;  %v644_v33 = vadd.f32 %v643_v9, %v3334_v59  ;;  %v1965_v59 = vunpack.c.l.b16 %v1827_v13  ;;  %v1845_v9 = vor.u32 %v1844_v7, %v1841_v54 }
  0xe2   : > { %v1855_v13 = vor.u32 %v1854_v53, %v1850_v61  ;;  %v2137_v46 = vrot.slane %v2135_v11, 4  ;;  %v1436_v7 = vrot.slane %v3262_v1, 5 }
  0xe3   : > { %2675 = vmatmul.msk.bf16.gmra.mxu1 %vm480_vm2, %v1483_v10  ;;  %v3514_v34 = vadd.f32 %v1323_v60, %v1022_v17  ;;  %v1979_v55 = vpack.c.b16 %v1966_v63, %v1965_v59  ;;  %v2176_v10 = vunpack.c.l.b16 %v2132_v3  ;;  %v1846_v44 = vrot.slane %v1845_v9, 4 }
  0xe4   : > { %v829_v22 = vpop.f32.mrf.mxu2  ;;  %v1860_v59 = vrot.slane %v1858_v16, 5  ;;  %v2794_v63 = vrot.slane %v2786_v19, 9  ;;  %v1876_v3 = vshrl.u32 %v3533_v24, 16  ;;  %v2841_v16 = vld [vmem:[%s3014_s11 + $0x3c] sm:$0xff]  ;;  %v3559_v19 = vld [vmem:[%s3014_s11 + $0x50] sm:$0x1] }
  0xe5   : > { %v865_v35 = vadd.f32 %v829_v22, %v641_v15  ;;  %v1430_v15 = vsel %vm3156_vm6, %v2662_v47, %v1429_v25  ;;  %v2757_v25 = vld [vmem:[%s3014_s11 + $0x48] sm:$0xf]  ;;  %v2189_v12 = vpack.c.b16 %v2176_v10, %v2175_v58  ;;  %v1856_v22 = vrot.slane %v1855_v13, 4 }
  0xe6   : > { %v1325_v0 = vpop.f32.mrf.mxu0  ;;  %v1471_v17 = vunpack.c.l.b16 %v1430_v15  ;;  %v1851_v56 = vsel %vm3042_vm3, %v1846_v44, %v1850_v61  ;;  %v2136_v1 = vsel %vm3156_vm6, %v2794_v63, %v2135_v11  ;;  %v1438_v10 = vrot.slane %v1436_v7, 4 }
  0xe7   : > { %v1861_v58 = vsel %vm3042_vm3, %v1856_v22, %v1860_v59  ;;  %v1878_v9 = vrot.slane %v1876_v3, 4 }
  0xe8   : > { %v987_v45 = vpop.f32.mrf.mxu3  ;;  %v645_v60 = vpop.f32.mrf.mxu1  ;;  %v1484_v47 = vpack.c.b16 %v1472_v49, %v1471_v17  ;;  %v1967_v17 = vunpack.c.l.b16 %v1851_v56  ;;  %v1968_v11 = vunpack.c.l.b16 %v1861_v58  ;;  %v2142_v56 = vrot.slane %v3533_v24, 5 }
  0xe9   : > { %v1023_v2 = vadd.f32 %v987_v45, %v865_v35  ;;  %2739 = vmatmul.msk.bf16.gmra.mxu2 %vm480_vm2, %v2840_v38  ;;  %v646_v21 = vadd.f32 %v645_v60, %v3353_v18  ;;  %v1863_v35 = vshrl.u32 %v2757_v25, 16  ;;  %v1866_v38 = vshll.u32 %v2757_v25, 16  ;;  %v2655_v45 = vld [vmem:[%s3014_s11 + $0x3c] sm:$0xe] }
  0xea   : > { %v2139_v60 = vsel %vm3156_vm6, %v2137_v46, %v2138_v37  ;;  %v1980_v63 = vpack.c.b16 %v1968_v11, %v1967_v17  ;;  %v2144_v17 = vrot.slane %v2142_v56, 4  ;;  %v2145_v11 = vrot.slane %v3559_v19, 5 }
  0xeb   : > { %v3535_v40 = vadd.f32 %v1325_v0, %v1023_v2  ;;  %v1868_v15 = vrot.slane %v1866_v38, 5  ;;  %v2663_v2 = vrot.slane %v2655_v45, 9  ;;  %v2178_v25 = vunpack.c.l.b16 %v2139_v60  ;;  %v2760_v38 = vld [vmem:[%s3014_s11 + $0x54] sm:$0xf] }
  0xec   : > { %v832_v28 = vpop.f32.mrf.mxu2  ;;  %v1890_v60 = vshll.u32 %v2760_v38, 16 }
  0xed   : > { %2777 = vmatmul.msk.bf16.gmra.mxu3 %vm480_vm2, %v1979_v55  ;;  %v866_v36 = vadd.f32 %v832_v28, %v644_v33  ;;  %v1872_v33 = vshll.u32 %v3533_v24, 16  ;;  %v1439_v55 = vrot.slane %v3277_v6, 5  ;;  %v2177_v28 = vunpack.c.l.b16 %v2136_v1 }
  0xee   : > { %v1328_v18 = vpop.f32.mrf.mxu0  ;;  %v1437_v44 = vsel %vm3156_vm6, %v2663_v2, %v1436_v7  ;;  %v1887_v1 = vshrl.u32 %v2760_v38, 16  ;;  %v1443_v24 = vrot.slane %v3290_v48, 5  ;;  %v1446_v48 = vrot.slane %v3304_v5, 5 }
  0xef   : > { %v3555_v61 = vrot.slane %v1872_v33, 5  ;;  %v1473_v37 = vunpack.c.l.b16 %v1437_v44  ;;  %v2146_v38 = vsel %vm3156_vm6, %v2144_v17, %v2145_v11  ;;  %v2763_v17 = vld [vmem:[%s3014_s11 + $0x60] sm:$0xf] }
  0xf0   : > { %v990_v51 = vpop.f32.mrf.mxu3  ;;  %v648_v54 = vpop.f32.mrf.mxu1 }
  0xf1   : > { %2807 = vmatmul.msk.bf16.gmra.mxu0 %vm480_vm2, %v2189_v12  ;;  %v1024_v0 = vadd.f32 %v990_v51, %v866_v36  ;;  %v649_v53 = vadd.f32 %v648_v54, %v3381_v30  ;;  %v1865_v30 = vrot.slane %v1863_v35, 4  ;;  %v3571_v51 = vld [vmem:[%s3014_s11 + $0x58] sm:$0xf]  ;;  %v2190_v54 = vpack.c.b16 %v2178_v25, %v2177_v28 }
  0xf2   : > { %v1889_v28 = vrot.slane %v1887_v1, 4  ;;  %v1892_v25 = vrot.slane %v1890_v60, 5 }
  0xf3   : > { %2676 = vmatmul.msk.bf16.gmra.mxu1 %vm480_vm2, %v1484_v47  ;;  %v3553_v41 = vadd.f32 %v1328_v18, %v1024_v0  ;;  %v1440_v18 = vsel %vm3156_vm6, %v1438_v10, %v1439_v55  ;;  %v1869_v22 = vor.u32 %v1868_v15, %v1865_v30  ;;  %v1882_v47 = vshll.u32 %v3559_v19, 16  ;;  %v2787_v55 = vld [vmem:[%s3014_s11 + $0x48] sm:$0xe] }
  0xf4   : > { %v834_v6 = vpop.f32.mrf.mxu2  ;;  %v1474_v35 = vunpack.c.l.b16 %v1440_v18  ;;  %v1896_v30 = vshll.u32 %v3571_v51, 16  ;;  %v1900_v15 = vshrl.u32 %v3571_v51, 16 }
  0xf5   : > { %v867_v13 = vadd.f32 %v834_v6, %v646_v21  ;;  %v1879_v21 = vor.u32 %v1878_v9, %v3555_v61  ;;  %v1870_v33 = vrot.slane %v1869_v22, 4  ;;  %v1884_v45 = vrot.slane %v1882_v47, 5 }
  0xf6   : > { %v1330_v49 = vpop.f32.mrf.mxu0  ;;  %v1485_v6 = vpack.c.b16 %v1474_v35, %v1473_v37  ;;  %v2795_v9 = vrot.slane %v2787_v55, 9  ;;  %v1445_v22 = vrot.slane %v1443_v24, 4 }
  0xf7   : > { %v1880_v3 = vrot.slane %v1879_v21, 4  ;;  %v3594_v21 = vld [vmem:[%s3014_s11 + $0x5c] sm:$0x1] }
  0xf8   : > { %v992_v12 = vpop.f32.mrf.mxu3  ;;  %v650_v36 = vpop.f32.mrf.mxu1  ;;  %v2143_v35 = vsel %vm3156_vm6, %v2795_v9, %v2142_v56  ;;  %v1906_v5 = vshll.u32 %v3594_v21, 16  ;;  %v2788_v9 = vld [vmem:[%s3014_s11 + $0x54] sm:$0xe] }
  0xf9   : > { %v1025_v59 = vadd.f32 %v992_v12, %v867_v13  ;;  %2740 = vmatmul.msk.bf16.gmra.mxu2 %vm480_vm2, %v2841_v16  ;;  %v651_v46 = vadd.f32 %v650_v36, %v3401_v14  ;;  %v1885_v16 = vsel %vm3042_vm3, %v1880_v3, %v1884_v45  ;;  %v1898_v12 = vrot.slane %v1896_v30, 5 }
  0xfa   : > { %v1902_v36 = vrot.slane %v1900_v15, 4  ;;  %v1970_v19 = vunpack.c.l.b16 %v1885_v16  ;;  %v2179_v56 = vunpack.c.l.b16 %v2143_v35  ;;  %v1453_v35 = vrot.slane %v3331_v57, 5 }
  0xfb   : > { %v3576_v58 = vadd.f32 %v1330_v49, %v1025_v59  ;;  %v2656_v49 = vld [vmem:[%s3014_s11 + $0x48] sm:$0xe] }
  0xfc   : > { %v837_v7 = vpop.f32.mrf.mxu2  ;;  %v2664_v18 = vrot.slane %v2656_v49, 9 }
  0xfd   : > { %2778 = vmatmul.msk.bf16.gmra.mxu3 %vm480_vm2, %v1980_v63  ;;  %v868_v0 = vadd.f32 %v837_v7, %v649_v53  ;;  %v1875_v53 = vsel %vm3042_vm3, %v1870_v33, %v3555_v61  ;;  %v2842_v63 = vld [vmem:[%s3014_s11 + $0x48] sm:$0xff]  ;;  %v1903_v7 = vor.u32 %v1902_v36, %v1898_v12  ;;  %v2796_v36 = vrot.slane %v2788_v9, 9 }
  0xfe   : > { %v1333_v14 = vpop.f32.mrf.mxu0  ;;  %v1969_v47 = vunpack.c.l.b16 %v1875_v53 }
  0xff   : > { %v1904_v60 = vrot.slane %v1903_v7, 4 }
 0x100   : > { %v995_v2 = vpop.f32.mrf.mxu3  ;;  %v653_v10 = vpop.f32.mrf.mxu1  ;;  %v1981_v55 = vpack.c.b16 %v1970_v19, %v1969_v47  ;;  %v2152_v47 = vrot.slane %v3594_v21, 5  ;;  %v2657_v19 = vld [vmem:[%s3014_s11 + $0x54] sm:$0xe] }
 0x101   : > { %2808 = vmatmul.msk.bf16.gmra.mxu0 %vm480_vm2, %v2190_v54  ;;  %v1026_v13 = vadd.f32 %v995_v2, %v868_v0  ;;  %v1893_v54 = vor.u32 %v1892_v25, %v1889_v28  ;;  %v1447_v0 = vsel %vm3156_vm6, %v1445_v22, %v1446_v48  ;;  %v654_v30 = vadd.f32 %v653_v10, %v3358_v29  ;;  %v3615_v28 = vld [vmem:[%s3014_s11 + $0x64] sm:$0xf] }
 0x102   : > { %v1908_v2 = vrot.slane %v1906_v5, 5  ;;  %v1911_v22 = vshrl.u32 %v2763_v17, 16 }
 0x103   : > { %2677 = vmatmul.msk.bf16.gmra.mxu1 %vm480_vm2, %v1485_v6  ;;  %v3590_v61 = vadd.f32 %v1333_v14, %v1026_v13  ;;  %v2180_v14 = vunpack.c.l.b16 %v2146_v38  ;;  %v1894_v1 = vrot.slane %v1893_v54, 4  ;;  %v1476_v6 = vunpack.c.l.b16 %v1447_v0 }
 0x104   : > { %v839_v44 = vpop.f32.mrf.mxu2  ;;  %v1909_v10 = vsel %vm3042_vm3, %v1904_v60, %v1908_v2  ;;  %v1913_v0 = vrot.slane %v1911_v22, 4 }
 0x105   : > { %v869_v59 = vadd.f32 %v839_v44, %v651_v46  ;;  %v1444_v46 = vsel %vm3156_vm6, %v2664_v18, %v1443_v24  ;;  %v2149_v24 = vrot.slane %v3571_v51, 5  ;;  %v2191_v13 = vpack.c.b16 %v2180_v14, %v2179_v56  ;;  %v2843_v56 = vld [vmem:[%s3014_s11 + $0x54] sm:$0xff] }
 0x106   : > { %v1335_v37 = vpop.f32.mrf.mxu0  ;;  %v1475_v15 = vunpack.c.l.b16 %v1444_v46  ;;  %v1899_v29 = vsel %vm3042_vm3, %v1894_v1, %v1898_v12  ;;  %v1450_v18 = vrot.slane %v3316_v32, 5  ;;  %v1920_v12 = vshll.u32 %v3615_v28, 16  ;;  %v2765_v1 = vld [vmem:[%s3014_s11 + $0x68] sm:$0x1] }
 0x107   : > { %v2151_v44 = vrot.slane %v2149_v24, 4  ;;  %v1971_v38 = vunpack.c.l.b16 %v1899_v29  ;;  %v1972_v32 = vunpack.c.l.b16 %v1909_v10  ;;  %v2150_v7 = vsel %vm3156_vm6, %v2796_v36, %v2149_v24 }
 0x108   : > { %v997_v33 = vpop.f32.mrf.mxu3  ;;  %v655_v3 = vpop.f32.mrf.mxu1  ;;  %v1486_v25 = vpack.c.b16 %v1476_v6, %v1475_v15  ;;  %v1452_v46 = vrot.slane %v1450_v18, 4  ;;  %v2181_v60 = vunpack.c.l.b16 %v2150_v7 }
 0x109   : > { %v1027_v45 = vadd.f32 %v997_v33, %v869_v59  ;;  %2741 = vmatmul.msk.bf16.gmra.mxu2 %vm480_vm2, %v2842_v63  ;;  %v1914_v59 = vshll.u32 %v2763_v17, 16  ;;  %v656_v54 = vadd.f32 %v655_v3, %v3388_v4  ;;  %v2665_v33 = vrot.slane %v2657_v19, 9 }
 0x10a   : > { %v2153_v57 = vsel %vm3156_vm6, %v2151_v44, %v2152_v47  ;;  %v1922_v4 = vrot.slane %v1920_v12, 5  ;;  %v1930_v17 = vshll.u32 %v2765_v1, 16  ;;  %v2156_v19 = vrot.slane %v3615_v28, 5  ;;  %v2766_v12 = vld [vmem:[%s3014_s11 + $0x6c] sm:$0xf] }
 0x10b   : > { %v3612_v11 = vadd.f32 %v1335_v37, %v1027_v45  ;;  %v1924_v37 = vshrl.u32 %v3615_v28, 16  ;;  %v1916_v45 = vrot.slane %v1914_v59, 5  ;;  %v2182_v15 = vunpack.c.l.b16 %v2153_v57  ;;  %v2789_v59 = vld [vmem:[%s3014_s11 + $0x60] sm:$0xe] }
 0x10c   : > { %v842_v53 = vpop.f32.mrf.mxu2  ;;  %v1451_v2 = vsel %vm3156_vm6, %v2665_v33, %v1450_v18  ;;  %v1932_v22 = vrot.slane %v1930_v17, 5  ;;  %v2658_v33 = vld [vmem:[%s3014_s11 + $0x60] sm:$0xe]  ;;  %v1935_v28 = vshrl.u32 %v2766_v12, 16  ;;  %v1460_v57 = vrot.slane %v3364_v39, 5 }
 0x10d   : > { %2779 = vmatmul.msk.bf16.gmra.mxu3 %vm480_vm2, %v1981_v55  ;;  %v870_v16 = vadd.f32 %v842_v53, %v654_v30  ;;  %v1926_v3 = vrot.slane %v1924_v37, 4  ;;  %v1454_v53 = vsel %vm3156_vm6, %v1452_v46, %v1453_v35  ;;  %v1917_v9 = vor.u32 %v1916_v45, %v1913_v0 }
 0x10e   : > { %v1338_v49 = vpop.f32.mrf.mxu0  ;;  %v1478_v29 = vunpack.c.l.b16 %v1454_v53  ;;  %v2192_v10 = vpack.c.b16 %v2182_v15, %v2181_v60  ;;  %v1938_v46 = vshll.u32 %v2766_v12, 16  ;;  %v2158_v0 = vrot.slane %v2156_v19, 4 }
 0x10f   : > { %v2159_v45 = vrot.slane %v2765_v1, 5  ;;  %v2844_v1 = vld [vmem:[%s3014_s11 + $0x60] sm:$0xff] }
 0x110   : > { %v1000_v51 = vpop.f32.mrf.mxu3  ;;  %v658_v48 = vpop.f32.mrf.mxu1 }
 0x111   : > { %2809 = vmatmul.msk.bf16.gmra.mxu0 %vm480_vm2, %v2191_v13  ;;  %v1028_v63 = vadd.f32 %v1000_v51, %v870_v16  ;;  %v1982_v13 = vpack.c.b16 %v1972_v32, %v1971_v38  ;;  %v1927_v16 = vor.u32 %v1926_v3, %v1922_v4  ;;  %v1918_v51 = vrot.slane %v1917_v9, 4 }
 0x112   : > { %v1457_v32 = vrot.slane %v3345_v8, 5  ;;  %v1937_v9 = vrot.slane %v1935_v28, 4 }
 0x113   : > { %2678 = vmatmul.msk.bf16.gmra.mxu1 %vm480_vm2, %v1486_v25  ;;  %v3632_v5 = vadd.f32 %v1338_v49, %v1028_v63  ;;  %v659_v49 = vadd.f32 %v658_v48, %v3409_v50  ;;  %v1477_v25 = vunpack.c.l.b16 %v1451_v2  ;;  %v1928_v18 = vrot.slane %v1927_v16, 4  ;;  %v3651_v48 = vld [vmem:[%s3014_s11 + $0x70] sm:$0xf]  ;;  %v2768_v16 = vld [vmem:[%s3014_s11 + $0x74] sm:$0x1] }
 0x114   : > { %v844_v21 = vpop.f32.mrf.mxu2  ;;  %v1923_v38 = vsel %vm3042_vm3, %v1918_v51, %v1922_v4  ;;  %v1459_v15 = vrot.slane %v1457_v32, 4  ;;  %v2163_v28 = vrot.slane %v3651_v48, 5 }
 0x115   : > { %v871_v55 = vadd.f32 %v844_v21, %v656_v54  ;;  %v1487_v50 = vpack.c.b16 %v1478_v29, %v1477_v25  ;;  %v2797_v54 = vrot.slane %v2789_v59, 9  ;;  %v1933_v21 = vsel %vm3042_vm3, %v1928_v18, %v1932_v22 }
 0x116   : > { %v1340_v14 = vpop.f32.mrf.mxu0  ;;  %v1974_v60 = vunpack.c.l.b16 %v1933_v21  ;;  %v1954_v59 = vshll.u32 %v2768_v16, 16 }
 0x117   : > { %v2157_v53 = vsel %vm3156_vm6, %v2797_v54, %v2156_v19 }
 0x118   : > { %v1002_v30 = vpop.f32.mrf.mxu3  ;;  %v660_v6 = vpop.f32.mrf.mxu1 }
 0x119   : > { %v1029_v24 = vadd.f32 %v1002_v30, %v871_v55  ;;  %2742 = vmatmul.msk.bf16.gmra.mxu2 %vm480_vm2, %v2843_v56  ;;  %v1944_v55 = vshll.u32 %v3651_v48, 16  ;;  %v1948_v56 = vshrl.u32 %v3651_v48, 16  ;;  %v661_v8 = vadd.f32 %v660_v6, %v3433_v20 }
 0x11a   : > { %v2666_v30 = vrot.slane %v2658_v33, 9  ;;  %v2160_v20 = vsel %vm3156_vm6, %v2158_v0, %v2159_v45  ;;  %v1956_v33 = vrot.slane %v1954_v59, 5  ;;  %v2790_v0 = vld [vmem:[%s3014_s11 + $0x6c] sm:$0xe] }
 0x11b   : > { %v3646_v63 = vadd.f32 %v1340_v14, %v1029_v24  ;;  %v1973_v14 = vunpack.c.l.b16 %v1923_v38  ;;  %v1940_v24 = vrot.slane %v1938_v46, 5  ;;  %v1946_v6 = vrot.slane %v1944_v55, 5 }
 0x11c   : > { %v847_v36 = vpop.f32.mrf.mxu2  ;;  %v1458_v29 = vsel %vm3156_vm6, %v2666_v30, %v1457_v32 }
 0x11d   : > { %2780 = vmatmul.msk.bf16.gmra.mxu3 %vm480_vm2, %v1982_v13  ;;  %v872_v44 = vadd.f32 %v847_v36, %v659_v49  ;;  %v1950_v13 = vrot.slane %v1948_v56, 4  ;;  %v2183_v49 = vunpack.c.l.b16 %v2157_v53  ;;  %v1983_v51 = vpack.c.b16 %v1974_v60, %v1973_v14 }
 0x11e   : > { %v1343_v47 = vpop.f32.mrf.mxu0  ;;  %v1941_v18 = vor.u32 %v1940_v24, %v1937_v9  ;;  %v1479_v19 = vunpack.c.l.b16 %v1458_v29 }
 0x11f   : > { %v1951_v22 = vor.u32 %v1950_v13, %v1946_v6 }
 0x120   : > { %v1005_v37 = vpop.f32.mrf.mxu3  ;;  %v663_v35 = vpop.f32.mrf.mxu1  ;;  %v1942_v32 = vrot.slane %v1941_v18, 4 }
 0x121   : > { %2810 = vmatmul.msk.bf16.gmra.mxu0 %vm480_vm2, %v2192_v10  ;;  %v1030_v7 = vadd.f32 %v1005_v37, %v872_v44  ;;  %v1461_v10 = vsel %vm3156_vm6, %v1459_v15, %v1460_v57  ;;  %v2184_v44 = vunpack.c.l.b16 %v2160_v20  ;;  %v1952_v21 = vrot.slane %v1951_v22, 4  ;;  %v2845_v15 = vld [vmem:[%s3014_s11 + $0x6c] sm:$0xff] }
 0x122   : > { %v1480_v12 = vunpack.c.l.b16 %v1461_v10  ;;  %v1947_v55 = vsel %vm3042_vm3, %v1942_v32, %v1946_v6  ;;  %v2798_v57 = vrot.slane %v2790_v0, 9 }
 0x123   : > { %2679 = vmatmul.msk.bf16.gmra.mxu1 %vm480_vm2, %v1487_v50  ;;  %v3665_v4 = vadd.f32 %v1343_v47, %v1030_v7  ;;  %v664_v47 = vadd.f32 %v663_v35, %v3368_v43  ;;  %v2193_v38 = vpack.c.b16 %v2184_v44, %v2183_v49  ;;  %v1957_v56 = vsel %vm3042_vm3, %v1952_v21, %v1956_v33 }
 0x124   : > { %v849_v3 = vpop.f32.mrf.mxu2  ;;  %v1488_v46 = vpack.c.b16 %v1480_v12, %v1479_v19  ;;  %v2164_v9 = vsel %vm3156_vm6, %v2798_v57, %v2163_v28 }
 0x125   : > { %v873_v2 = vadd.f32 %v849_v3, %v661_v8  ;;  %v2165_v8 = vrot.slane %v2163_v28, 4  ;;  %v2166_v3 = vrot.slane %v2768_v16, 5  ;;  %v2185_v6 = vunpack.c.l.b16 %v2164_v9  ;;  %v3715_v28 = vld [vmem:[%s3823_s2] ss:$0 sm:$0xff] }
 0x126   : > { %v1345_v39 = vpop.f32.mrf.mxu0 }
 0x127   : > { %v2167_v31 = vsel %vm3156_vm6, %v2165_v8, %v2166_v3 }
 0x128   : > { %v1007_v17 = vpop.f32.mrf.mxu3  ;;  %v665_v25 = vpop.f32.mrf.mxu1  ;;  %v2186_v13 = vunpack.c.l.b16 %v2167_v31 }
 0x129   : > { %v1031_v36 = vadd.f32 %v1007_v17, %v873_v2  ;;  %2743 = vmatmul.msk.bf16.gmra.mxu2 %vm480_vm2, %v2844_v1  ;;  %v666_v14 = vadd.f32 %v665_v25, %v3394_v27  ;;  %v1975_v2 = vunpack.c.l.b16 %v1947_v55  ;;  %v1976_v1 = vunpack.c.l.b16 %v1957_v56 }
 0x12a   : > { %v2194_v25 = vpack.c.b16 %v2186_v13, %v2185_v6 }
 0x12b   : > { %v3679_v50 = vadd.f32 %v1345_v39, %v1031_v36  ;;  %v1984_v27 = vpack.c.b16 %v1976_v1, %v1975_v2 }
 0x12c   : > { %v852_v37 = vpop.f32.mrf.mxu2 }
 0x12d   : > { %2781 = vmatmul.msk.bf16.gmra.mxu3 %vm480_vm2, %v1983_v51  ;;  %v874_v54 = vadd.f32 %v852_v37, %v664_v47 }
 0x12e   : > { %v1348_v7 = vpop.f32.mrf.mxu0 }
 0x130   : > { %v1010_v45 = vpop.f32.mrf.mxu3  ;;  %v668_v43 = vpop.f32.mrf.mxu1 }
 0x131   : > { %2811 = vmatmul.msk.bf16.gmra.mxu0 %vm480_vm2, %v2193_v38  ;;  %v1032_v35 = vadd.f32 %v1010_v45, %v874_v54  ;;  %v669_v16 = vadd.f32 %v668_v43, %v3420_v42 }
 0x133   : > { %2680 = vmatmul.msk.bf16.gmra.mxu1 %vm480_vm2, %v1488_v46  ;;  %v3691_v48 = vadd.f32 %v1348_v7, %v1032_v35 }
 0x134   : > { %v854_v60 = vpop.f32.mrf.mxu2 }
 0x135   : > { %v875_v30 = vadd.f32 %v854_v60, %v666_v14 }
 0x136   : > { %v1350_v53 = vpop.f32.mrf.mxu0 }
 0x138   : > { %v1012_v24 = vpop.f32.mrf.mxu3  ;;  %v670_v39 = vpop.f32.mrf.mxu1 }
 0x139   : > { %v1033_v20 = vadd.f32 %v1012_v24, %v875_v30  ;;  %2744 = vmatmul.msk.bf16.gmra.mxu2 %vm480_vm2, %v2845_v15  ;;  %v671_v44 = vadd.f32 %v670_v39, %v3446_v52 }
 0x13b   : > { %v3700_v17 = vadd.f32 %v1350_v53, %v1033_v20 }
 0x13c   : > { %v857_v49 = vpop.f32.mrf.mxu2 }
 0x13d   : > { %2782 = vmatmul.msk.bf16.gmra.mxu3 %vm480_vm2, %v1984_v27  ;;  %v876_v29 = vadd.f32 %v857_v49, %v669_v16 }
 0x13e   : > { %v1353_v26 = vpop.f32.mrf.mxu0 }
 0x140   : > { %v1015_v10 = vpop.f32.mrf.mxu3  ;;  %v1528_v36 = vpop.f32.mrf.mxu1 }
 0x141   : > { %2812 = vmatmul.msk.bf16.gmra.mxu0 %vm480_vm2, %v2194_v25  ;;  %v1034_v51 = vadd.f32 %v1015_v10, %v876_v29  ;;  %v1568_v37 = vadd.f32 %v1528_v36, %v3477_v62  ;;  %v3720_v62 = vld [vmem:[%s3824_s3] ss:$0 sm:$0xff] }
 0x143   : > { %v3705_v18 = vadd.f32 %v1353_v26, %v1034_v51 }
 0x144   : > { %v859_v42 = vpop.f32.mrf.mxu2 }
 0x145   : > { %v877_v22 = vadd.f32 %v859_v42, %v671_v44 }
 0x146   : > { %v1355_v59 = vpop.f32.mrf.mxu0 }
 0x148   : > { %v1017_v47 = vpop.f32.mrf.mxu3  ;;  %v1530_v19 = vpop.f32.mrf.mxu1 }
 0x149   : > { %v1035_v12 = vadd.f32 %v1017_v47, %v877_v22  ;;  %v1569_v0 = vadd.f32 %v1530_v19, %v3494_v23 }
 0x14b   : > { %v3709_v38 = vadd.f32 %v1355_v59, %v1035_v12 }
 0x14c   : > { %v1686_v54 = vpop.f32.mrf.mxu2 }
 0x14d   : > { %v1726_v32 = vadd.f32 %v1686_v54, %v1568_v37 }
 0x14e   : > { %v2234_v7 = vpop.f32.mrf.mxu0 }
 0x150   : > { %v2024_v52 = vpop.f32.mrf.mxu3  ;;  %v1533_v21 = vpop.f32.mrf.mxu1 }
 0x151   : > { %v2064_v33 = vadd.f32 %v2024_v52, %v1726_v32  ;;  %v1570_v60 = vadd.f32 %v1533_v21, %v3514_v34 }
 0x153   : > { %v2274_v46 = vadd.f32 %v2234_v7, %v2064_v33 }
 0x154   : > { %v1688_v45 = vpop.f32.mrf.mxu2 }
 0x155   : > { %v2294_v43 = vmul.f32 %v3715_v28, %v2274_v46  ;;  %v1727_v35 = vadd.f32 %v1688_v45, %v1569_v0 }
 0x156   : > { %v2236_v55 = vpop.f32.mrf.mxu0 }
 0x157   : > { %v2314_v56 = vadd.f32 %v3720_v62, %v2294_v43 }
 0x158   : > { %v2026_v57 = vpop.f32.mrf.mxu3  ;;  %v1535_v8 = vpop.f32.mrf.mxu1 }
 0x159   : > { %v2330_v3 = vmax.f32 %v2314_v56, 0.0  ;;  %v2065_v23 = vadd.f32 %v2026_v57, %v1727_v35  ;;  %v1571_v27 = vadd.f32 %v1535_v8, %v3535_v40 }
 0x15b   : > { %2347 = vst.msk [vmem:[%s3728_s9] sm:$0xff] %vm2346_vm7, %v2330_v3  ;;  %v2275_v14 = vadd.f32 %v2236_v55, %v2065_v23 }
 0x15c   : > { %v1691_v30 = vpop.f32.mrf.mxu2 }
 0x15d   : > { %v2295_v15 = vmul.f32 %v3715_v28, %v2275_v14  ;;  %v1728_v2 = vadd.f32 %v1691_v30, %v1570_v60 }
 0x15e   : > { %v2239_v1 = vpop.f32.mrf.mxu0 }
 0x15f   : > { %v2315_v53 = vadd.f32 %v3720_v62, %v2295_v15 }
 0x160   : > { %v2029_v9 = vpop.f32.mrf.mxu3  ;;  %v1538_v31 = vpop.f32.mrf.mxu1 }
 0x161   : > { %v2331_v24 = vmax.f32 %v2315_v53, 0.0  ;;  %v2066_v39 = vadd.f32 %v2029_v9, %v1728_v2  ;;  %v1572_v51 = vadd.f32 %v1538_v31, %v3553_v41 }
 0x163   : > { %2348 = vst.msk [vmem:[%s3728_s9 + $0x8] sm:$0xff] %vm2346_vm7, %v2331_v24  ;;  %v2276_v20 = vadd.f32 %v2239_v1, %v2066_v39 }
 0x164   : > { %v1693_v6 = vpop.f32.mrf.mxu2 }
 0x165   : > { %v2296_v34 = vmul.f32 %v3715_v28, %v2276_v20  ;;  %v1729_v13 = vadd.f32 %v1693_v6, %v1571_v27 }
 0x166   : > { %v2241_v16 = vpop.f32.mrf.mxu0 }
 0x167   : > { %v2316_v49 = vadd.f32 %v3720_v62, %v2296_v34 }
 0x168   : > { %v2031_v25 = vpop.f32.mrf.mxu3  ;;  %v1540_v29 = vpop.f32.mrf.mxu1 }
 0x169   : > { %v2332_v26 = vmax.f32 %v2316_v49, 0.0  ;;  %v2067_v10 = vadd.f32 %v2031_v25, %v1729_v13  ;;  %v1573_v32 = vadd.f32 %v1540_v29, %v3576_v58 }
 0x16b   : > { %2349 = vst.msk [vmem:[%s3728_s9 + $0x10] sm:$0xff] %vm2346_vm7, %v2332_v26  ;;  %v2277_v36 = vadd.f32 %v2241_v16, %v2067_v10 }
 0x16c   : > { %v1696_v44 = vpop.f32.mrf.mxu2 }
 0x16d   : > { %v2297_v40 = vmul.f32 %v3715_v28, %v2277_v36  ;;  %v1730_v42 = vadd.f32 %v1696_v44, %v1572_v51 }
 0x16e   : > { %v2244_v22 = vpop.f32.mrf.mxu0 }
 0x16f   : > { %v2317_v59 = vadd.f32 %v3720_v62, %v2297_v40 }
 0x170   : > { %v2034_v47 = vpop.f32.mrf.mxu3  ;;  %v1543_v19 = vpop.f32.mrf.mxu1 }
 0x171   : > { %v2333_v12 = vmax.f32 %v2317_v59, 0.0  ;;  %v2068_v37 = vadd.f32 %v2034_v47, %v1730_v42  ;;  %v1574_v55 = vadd.f32 %v1543_v19, %v3590_v61 }
 0x173   : > { %2350 = vst.msk [vmem:[%s3728_s9 + $0x18] sm:$0xff] %vm2346_vm7, %v2333_v12  ;;  %v2278_v54 = vadd.f32 %v2244_v22, %v2068_v37 }
 0x174   : > { %v1698_v7 = vpop.f32.mrf.mxu2 }
 0x175   : > { %v2298_v41 = vmul.f32 %v3715_v28, %v2278_v54  ;;  %v1731_v52 = vadd.f32 %v1698_v7, %v1573_v32 }
 0x176   : > { %v2246_v21 = vpop.f32.mrf.mxu0 }
 0x177   : > { %v2318_v33 = vadd.f32 %v3720_v62, %v2298_v41 }
 0x178   : > { %v2036_v46 = vpop.f32.mrf.mxu3  ;;  %v1545_v0 = vpop.f32.mrf.mxu1 }
 0x179   : > { %v2334_v45 = vmax.f32 %v2318_v33, 0.0  ;;  %v2069_v43 = vadd.f32 %v2036_v46, %v1731_v52  ;;  %v1575_v2 = vadd.f32 %v1545_v0, %v3612_v11 }
 0x17b   : > { %2351 = vst.msk [vmem:[%s3728_s9 + $0x20] sm:$0xff] %vm2346_vm7, %v2334_v45  ;;  %v2279_v35 = vadd.f32 %v2246_v21, %v2069_v43 }
 0x17c   : > { %v1701_v56 = vpop.f32.mrf.mxu2 }
 0x17d   : > { %v2299_v58 = vmul.f32 %v3715_v28, %v2279_v35  ;;  %v1732_v57 = vadd.f32 %v1701_v56, %v1574_v55 }
 0x17e   : > { %v2249_v8 = vpop.f32.mrf.mxu0 }
 0x17f   : > { %v2319_v3 = vadd.f32 %v3720_v62, %v2299_v58 }
 0x180   : > { %v2039_v23 = vpop.f32.mrf.mxu3  ;;  %v1548_v14 = vpop.f32.mrf.mxu1 }
 0x181   : > { %v2335_v60 = vmax.f32 %v2319_v3, 0.0  ;;  %v2070_v30 = vadd.f32 %v2039_v23, %v1732_v57  ;;  %v1576_v34 = vadd.f32 %v1548_v14, %v3632_v5 }
 0x183   : > { %2352 = vst.msk [vmem:[%s3728_s9 + $0x28] sm:$0xff] %vm2346_vm7, %v2335_v60  ;;  %v2280_v15 = vadd.f32 %v2249_v8, %v2070_v30 }
 0x184   : > { %v1703_v1 = vpop.f32.mrf.mxu2 }
 0x185   : > { %v2300_v61 = vmul.f32 %v3715_v28, %v2280_v15  ;;  %v1733_v53 = vadd.f32 %v1703_v1, %v1575_v2 }
 0x186   : > { %v2251_v9 = vpop.f32.mrf.mxu0 }
 0x187   : > { %v2320_v31 = vadd.f32 %v3720_v62, %v2300_v61 }
 0x188   : > { %v2041_v24 = vpop.f32.mrf.mxu3  ;;  %v1550_v39 = vpop.f32.mrf.mxu1 }
 0x189   : > { %v2336_v20 = vmax.f32 %v2320_v31, 0.0  ;;  %v2071_v27 = vadd.f32 %v2041_v24, %v1733_v53  ;;  %v1577_v44 = vadd.f32 %v1550_v39, %v3646_v63 }
 0x18b   : > { %2353 = vst.msk [vmem:[%s3728_s9 + $0x30] sm:$0xff] %vm2346_vm7, %v2336_v20  ;;  %v2281_v6 = vadd.f32 %v2251_v9, %v2071_v27 }
 0x18c   : > { %v1706_v13 = vpop.f32.mrf.mxu2 }
 0x18d   : > { %v2301_v11 = vmul.f32 %v3715_v28, %v2281_v6  ;;  %v1734_v16 = vadd.f32 %v1706_v13, %v1576_v34 }
 0x18e   : > { %v2254_v49 = vpop.f32.mrf.mxu0 }
 0x18f   : > { %v2321_v25 = vadd.f32 %v3720_v62, %v2301_v11 }
 0x190   : > { %v2044_v29 = vpop.f32.mrf.mxu3  ;;  %v1553_v26 = vpop.f32.mrf.mxu1 }
 0x191   : > { %v2337_v10 = vmax.f32 %v2321_v25, 0.0  ;;  %v2072_v36 = vadd.f32 %v2044_v29, %v1734_v16  ;;  %v1578_v32 = vadd.f32 %v1553_v26, %v3665_v4 }
 0x193   : > { %2354 = vst.msk [vmem:[%s3728_s9 + $0x38] sm:$0xff] %vm2346_vm7, %v2337_v10  ;;  %v2282_v51 = vadd.f32 %v2254_v49, %v2072_v36 }
 0x194   : > { %v1708_v40 = vpop.f32.mrf.mxu2 }
 0x195   : > { %v2302_v5 = vmul.f32 %v3715_v28, %v2282_v51  ;;  %v1735_v42 = vadd.f32 %v1708_v40, %v1577_v44 }
 0x196   : > { %v2256_v22 = vpop.f32.mrf.mxu0 }
 0x197   : > { %v2322_v59 = vadd.f32 %v3720_v62, %v2302_v5 }
 0x198   : > { %v2046_v47 = vpop.f32.mrf.mxu3  ;;  %v1555_v19 = vpop.f32.mrf.mxu1 }
 0x199   : > { %v2338_v12 = vmax.f32 %v2322_v59, 0.0  ;;  %v2073_v37 = vadd.f32 %v2046_v47, %v1735_v42  ;;  %v1579_v35 = vadd.f32 %v1555_v19, %v3679_v50 }
 0x19b   : > { %2355 = vst.msk [vmem:[%s3728_s9 + $0x40] sm:$0xff] %vm2346_vm7, %v2338_v12  ;;  %v2283_v54 = vadd.f32 %v2256_v22, %v2073_v37 }
 0x19c   : > { %v1711_v7 = vpop.f32.mrf.mxu2 }
 0x19d   : > { %v2303_v63 = vmul.f32 %v3715_v28, %v2283_v54  ;;  %v1736_v41 = vadd.f32 %v1711_v7, %v1578_v32 }
 0x19e   : > { %v2259_v52 = vpop.f32.mrf.mxu0 }
 0x19f   : > { %v2323_v21 = vadd.f32 %v3720_v62, %v2303_v63 }
 0x1a0   : > { %v2049_v33 = vpop.f32.mrf.mxu3  ;;  %v1558_v45 = vpop.f32.mrf.mxu1 }
 0x1a1   : > { %v2339_v46 = vmax.f32 %v2323_v21, 0.0  ;;  %v2074_v0 = vadd.f32 %v2049_v33, %v1736_v41  ;;  %v1580_v60 = vadd.f32 %v1558_v45, %v3691_v48 }
 0x1a3   : > { %2356 = vst.msk [vmem:[%s3728_s9 + $0x48] sm:$0xff] %vm2346_vm7, %v2339_v46  ;;  %v2284_v43 = vadd.f32 %v2259_v52, %v2074_v0 }
 0x1a4   : > { %v1713_v55 = vpop.f32.mrf.mxu2 }
 0x1a5   : > { %v2304_v4 = vmul.f32 %v3715_v28, %v2284_v43  ;;  %v1737_v56 = vadd.f32 %v1713_v55, %v1579_v35 }
 0x1a6   : > { %v2261_v58 = vpop.f32.mrf.mxu0 }
 0x1a7   : > { %v2324_v57 = vadd.f32 %v3720_v62, %v2304_v4 }
 0x1a8   : > { %v2051_v8 = vpop.f32.mrf.mxu3  ;;  %v1560_v30 = vpop.f32.mrf.mxu1 }
 0x1a9   : > { %v2340_v3 = vmax.f32 %v2324_v57, 0.0  ;;  %v2075_v23 = vadd.f32 %v2051_v8, %v1737_v56  ;;  %v1581_v39 = vadd.f32 %v1560_v30, %v3700_v17 }
 0x1ab   : > { %2357 = vst.msk [vmem:[%s3728_s9 + $0x50] sm:$0xff] %vm2346_vm7, %v2340_v3  ;;  %v2285_v14 = vadd.f32 %v2261_v58, %v2075_v23 }
 0x1ac   : > { %v1716_v15 = vpop.f32.mrf.mxu2 }
 0x1ad   : > { %v2305_v50 = vmul.f32 %v3715_v28, %v2285_v14  ;;  %v1738_v2 = vadd.f32 %v1716_v15, %v1580_v60 }
 0x1ae   : > { %v2264_v1 = vpop.f32.mrf.mxu0 }
 0x1af   : > { %v2325_v61 = vadd.f32 %v3720_v62, %v2305_v50 }
 0x1b0   : > { %v2054_v53 = vpop.f32.mrf.mxu3  ;;  %v1563_v6 = vpop.f32.mrf.mxu1 }
 0x1b1   : > { %v2341_v9 = vmax.f32 %v2325_v61, 0.0  ;;  %v2076_v31 = vadd.f32 %v2054_v53, %v1738_v2  ;;  %v1582_v29 = vadd.f32 %v1563_v6, %v3705_v18 }
 0x1b3   : > { %2358 = vst.msk [vmem:[%s3728_s9 + $0x58] sm:$0xff] %vm2346_vm7, %v2341_v9  ;;  %v2286_v24 = vadd.f32 %v2264_v1, %v2076_v31 }
 0x1b4   : > { %v1718_v20 = vpop.f32.mrf.mxu2 }
 0x1b5   : > { %v2306_v48 = vmul.f32 %v3715_v28, %v2286_v24  ;;  %v1739_v27 = vadd.f32 %v1718_v20, %v1581_v39 }
 0x1b6   : > { %v2266_v34 = vpop.f32.mrf.mxu0 }
 0x1b7   : > { %v2326_v13 = vadd.f32 %v3720_v62, %v2306_v48 }
 0x1b8   : > { %v2056_v11 = vpop.f32.mrf.mxu3  ;;  %v1565_v51 = vpop.f32.mrf.mxu1 }
 0x1b9   : > { %v2342_v16 = vmax.f32 %v2326_v13, 0.0  ;;  %v2077_v49 = vadd.f32 %v2056_v11, %v1739_v27  ;;  %v1583_v59 = vadd.f32 %v1565_v51, %v3709_v38 }
 0x1bb   : > { %2359 = vst.msk [vmem:[%s3728_s9 + $0x60] sm:$0xff] %vm2346_vm7, %v2342_v16  ;;  %v2287_v25 = vadd.f32 %v2266_v34, %v2077_v49 }
 0x1bc   : > { %v1721_v26 = vpop.f32.mrf.mxu2 }
 0x1bd   : > { %v2307_v17 = vmul.f32 %v3715_v28, %v2287_v25  ;;  %v1740_v10 = vadd.f32 %v1721_v26, %v1582_v29 }
 0x1be   : > { %v2269_v44 = vpop.f32.mrf.mxu0 }
 0x1bf   : > { %v2327_v36 = vadd.f32 %v3720_v62, %v2307_v17 }
 0x1c0   : > { %v2059_v40 = vpop.f32.mrf.mxu3 }
 0x1c1   : > { %v2343_v5 = vmax.f32 %v2327_v36, 0.0  ;;  %v2078_v42 = vadd.f32 %v2059_v40, %v1740_v10 }
 0x1c3   : > { %2360 = vst.msk [vmem:[%s3728_s9 + $0x68] sm:$0xff] %vm2346_vm7, %v2343_v5  ;;  %v2288_v22 = vadd.f32 %v2269_v44, %v2078_v42 }
 0x1c4   : > { %v1723_v47 = vpop.f32.mrf.mxu2 }
 0x1c5   : > { %v2308_v18 = vmul.f32 %v3715_v28, %v2288_v22  ;;  %v1741_v19 = vadd.f32 %v1723_v47, %v1583_v59 }
 0x1c6   : > { %v2271_v7 = vpop.f32.mrf.mxu0 }
 0x1c7   : > { %v2328_v12 = vadd.f32 %v3720_v62, %v2308_v18 }
 0x1c8   : > { %v2061_v37 = vpop.f32.mrf.mxu3 }
 0x1c9   : > { %v2344_v54 = vmax.f32 %v2328_v12, 0.0  ;;  %v2079_v32 = vadd.f32 %v2061_v37, %v1741_v19 }
 0x1cb   : > { %2361 = vst.msk [vmem:[%s3728_s9 + $0x70] sm:$0xff] %vm2346_vm7, %v2344_v54  ;;  %v2289_v63 = vadd.f32 %v2271_v7, %v2079_v32 }
 0x1cd   : > { %v2309_v41 = vmul.f32 %v3715_v28, %v2289_v63 }
 0x1cf   : > { %v2329_v52 = vadd.f32 %v3720_v62, %v2309_v41 }
 0x1d1   : > { %v2345_v21 = vmax.f32 %v2329_v52, 0.0 }
 0x1d3   : > { %2362 = vst.msk [vmem:[%s3728_s9 + $0x78] sm:$0xff] %vm2346_vm7, %v2345_v21 }
 0x1d4 PF: > { %s14_s19 = sadd.s32 1, %s2933_s19   ;;  %s3830_s15 = smov %s2925_s17 }
 0x1d5   : > { %p11_p7 = scmp.ge.s32.totalorder %s14_s19, 6   ;;  %s3831_s16 = smov %s2929_s18 }
 0x1d6   : > { %s3832_s17 = smov %s3835_s20  ;;  %s3833_s18 = smov %s3839_s21 }
 0x1d7   :  { %13 = sbr.rel (!%p11_p7) target bundleno = 3 (0x3), region = 77 }

</bundles_post_ra>
